<compile_context>
chip_gen: v6e
topology: v6e:2x2x1
jax: 0.10.0
libtpu: 0.0.40
codegen_flags: <defaults>
</compile_context>

<pallas_src>
import jax
import jax.numpy as jnp
from jax import lax
from jax.experimental import pallas as pl
from jax.experimental.pallas import tpu as pltpu


# ----------------------------------------------------------------------------
# Pallas kernel 1: farthest point sampling (one batch per grid step)
# ----------------------------------------------------------------------------
def _fps_kernel(xyz_t_ref, idx_ref):
    """xyz_t_ref: (1, 3, N) coords (N lane-dense); idx_ref: (1, S, 1) int32."""
    x = xyz_t_ref[0].astype(jnp.float32)            # (3, N)
    n = x.shape[1]
    s = idx_ref.shape[1]
    x0, x1, x2 = x[0:1, :], x[1:2, :], x[2:3, :]    # (1, N) each
    iota_n = lax.broadcasted_iota(jnp.int32, (1, n), 1)
    iota_s = lax.broadcasted_iota(jnp.int32, (s, 1), 0)

    def body(i, carry):
        far, dist, idxs = carry
        # record the current farthest point as centroid i
        idxs = jnp.where(iota_s == i, far, idxs)
        # extract centroid coordinates via a one-hot reduction (no dynamic
        # lane indexing needed)
        sel = iota_n == far
        c0 = jnp.sum(jnp.where(sel, x0, 0.0))
        c1 = jnp.sum(jnp.where(sel, x1, 0.0))
        c2 = jnp.sum(jnp.where(sel, x2, 0.0))
        d0 = x0 - c0
        d1 = x1 - c1
        d2 = x2 - c2
        d = d0 * d0 + d1 * d1 + d2 * d2
        dist = jnp.minimum(dist, d)
        # argmax with lowest-index tie-break (max + iota-min trick)
        m = jnp.max(dist)
        far = jnp.min(jnp.where(dist == m, iota_n, n)).astype(jnp.int32)
        return far, dist, idxs

    init = (jnp.array(0, dtype=jnp.int32),
            jnp.full((1, n), 1e10, jnp.float32),
            jnp.zeros((s, 1), jnp.int32))
    _, _, idxs = lax.fori_loop(0, s, body, init)
    idx_ref[0] = idxs


def pallas_fps(xyz_t, npoint):
    """xyz_t: (B, 3, N) -> (B, npoint) int32 FPS indices.

    # TODO(synk): the pointnet2 CUDA kernel's start point is implementation
    # defined (pure-python variant uses a random start); we start at index 0
    # deterministically.
    """
    B, C, N = xyz_t.shape
    out = pl.pallas_call(
        _fps_kernel,
        out_shape=jax.ShapeDtypeStruct((B, npoint, 1), jnp.int32),
        grid=(B,),
        in_specs=[pl.BlockSpec((1, C, N), lambda b: (b, 0, 0))],
        out_specs=pl.BlockSpec((1, npoint, 1), lambda b: (b, 0, 0)),
        compiler_params=pltpu.CompilerParams(dimension_semantics=("parallel",)),
    )(xyz_t)
    return out[:, :, 0]


# ----------------------------------------------------------------------------
# Pallas kernel 2: fused KNN selection + grouping (one (batch, S-tile) block)
# ----------------------------------------------------------------------------
def _knn_group_kernel(q_ref, xyz_t_ref, pts_ref, ctr_ref, out_ref):
    """q_ref:(1,tS,3) xyz_t_ref:(1,3,N) pts_ref:(1,N,D) ctr_ref:(1,tS,D)
    out_ref:(1,tS,K,2D)."""
    q = q_ref[0].astype(jnp.float32)                # (tS, 3)  queries on sublanes
    x = xyz_t_ref[0].astype(jnp.float32)            # (3, N)   points on lanes
    pts = pts_ref[0]                                # (N, D)   keep original dtype
    ctr = ctr_ref[0]                                # (tS, D)

    ts, n = q.shape[0], x.shape[1]
    k = out_ref.shape[2]
    d_feat = pts.shape[1]

    # --- squared pairwise distances on the VPU (3 broadcast FMAs, no MXU) ---
    dist = jnp.zeros((ts, n), jnp.float32)
    for c in range(q.shape[1]):
        diff = q[:, c:c + 1] - x[c:c + 1, :]        # (tS,1)-(1,N) -> (tS,N)
        dist = dist + diff * diff

    # --- fused K-nearest selection + one-hot MXU gather ----------------------
    # The selection mask of each round is exactly the one-hot row needed for
    # the gather, so neither a (S,K,N) one-hot nor the distance matrix ever
    # leaves VMEM.
    # TODO(synk): a true index gather (scalar-prefetched idx + DMA rows) could
    # replace the one-hot matmul for very large N.
    iota_n = lax.broadcasted_iota(jnp.int32, (ts, n), 1)
    iota_k = lax.broadcasted_iota(jnp.int32, (ts, k, 1), 1)
    grouped = jnp.zeros((ts, k, d_feat), jnp.float32)
    for kk in range(k):
        dmin = jnp.min(dist, axis=-1, keepdims=True)                      # (tS,1)
        sel = jnp.min(jnp.where(dist == dmin, iota_n, n), axis=-1,
                      keepdims=True)                                      # (tS,1)
        hit = iota_n == sel                                               # (tS,N)
        gk = jnp.dot(hit.astype(pts.dtype), pts,
                     preferred_element_type=jnp.float32)                  # (tS,D)
        grouped = jnp.where(iota_k == kk, gk[:, None, :], grouped)
        dist = jnp.where(hit, jnp.inf, dist)                              # mask picked

    # --- write the two output halves with separate stores (no concat) -------
    ctr_f32 = ctr.astype(jnp.float32)
    out_ref[0, :, :, :d_feat] = (grouped - ctr_f32[:, None, :]).astype(out_ref.dtype)
    out_ref[0, :, :, d_feat:] = jnp.broadcast_to(
        ctr[:, None, :], (ts, k, d_feat)).astype(out_ref.dtype)


def _pick_s_tile(S, N, K, D, itemsize, budget_bytes=8 << 20):
    """Largest S-tile whose per-tile VMEM temporaries fit a conservative budget
    (sized so the kernel also fits v7x's 64 MiB VMEM / 32 MiB scoped default)."""
    per_row = 12 * N + 8 * K * D + 2 * K * D * itemsize
    cap = max(8, budget_bytes // max(per_row, 1))
    if S <= cap:
        return S
    ts = (min(cap, S) // 8) * 8
    while ts > 8 and S % ts:
        ts -= 8
    return ts if (ts >= 8 and S % ts == 0) else S


def pallas_knn_group(new_xyz, xyz_t, points, centers, kneighbors):
    B, S, C = new_xyz.shape
    _, _, N = xyz_t.shape
    D = points.shape[-1]
    ts = _pick_s_tile(S, N, kneighbors, D, points.dtype.itemsize)
    assert S % ts == 0
    return pl.pallas_call(
        _knn_group_kernel,
        out_shape=jax.ShapeDtypeStruct((B, S, kneighbors, 2 * D), points.dtype),
        grid=(B, S // ts),
        in_specs=[
            pl.BlockSpec((1, ts, C), lambda b, s: (b, s, 0)),
            pl.BlockSpec((1, C, N), lambda b, s: (b, 0, 0)),   # resident over S-tiles
            pl.BlockSpec((1, N, D), lambda b, s: (b, 0, 0)),   # resident over S-tiles
            pl.BlockSpec((1, ts, D), lambda b, s: (b, s, 0)),
        ],
        out_specs=pl.BlockSpec((1, ts, kneighbors, 2 * D),
                               lambda b, s: (b, s, 0, 0)),
        compiler_params=pltpu.CompilerParams(
            dimension_semantics=("parallel", "parallel")),
    )(new_xyz, xyz_t, points, centers)


# ----------------------------------------------------------------------------
# Module forward
# ----------------------------------------------------------------------------
def local_grouper(xyz, points, groups, kneighbors):
    """xyz [B,N,3], points [B,N,D] -> new_xyz [B,S,3], new_points [B,S,K,2D]."""
    xyz_t = jnp.transpose(xyz, (0, 2, 1))                    # (B,3,N) lane-dense coords
    fps_idx = pallas_fps(xyz_t, groups)                      # (B,S) int32
    # TODO(synk): these two tiny (B,S)-row gathers stay in plain JAX; they move
    # only S*(3+D) values per batch.
    new_xyz = jnp.take_along_axis(xyz, fps_idx[:, :, None], axis=1)          # (B,S,3)
    center_feat = jnp.take_along_axis(points, fps_idx[:, :, None], axis=1)   # (B,S,D)
    new_points = pallas_knn_group(new_xyz, xyz_t, points, center_feat, kneighbors)
    return new_xyz, new_points


# ----------------------------------------------------------------------------
if __name__ == "__main__":
    key = jax.random.PRNGKey(0)
    k1, k2 = jax.random.split(key)

    B, N, D = 2, 64, 16
    groups, kneighbors = 16, 8

    xyz = jax.random.normal(k1, (B, N, 3), dtype=jnp.float32)
    points = jax.random.normal(k2, (B, N, D), dtype=jnp.float32)

    new_xyz, new_points = jax.jit(
        lambda a, b: local_grouper(a, b, groups, kneighbors)
    )(xyz, points)
    jax.block_until_ready((new_xyz, new_points))

    assert new_xyz.shape == (B, groups, 3)
    assert new_points.shape == (B, groups, kneighbors, 2 * D)

    # ---- pure-JAX reference (same semantics as the PyTorch module) ----
    def ref_fps(pc, npoint):
        Bb, Nn, _ = pc.shape

        def body(i, state):
            cent, distance, far = state
            cent = cent.at[:, i].set(far)
            c = jnp.take_along_axis(pc, far[:, None, None], axis=1)
            d = jnp.sum((pc - c) ** 2, axis=-1)
            distance = jnp.minimum(distance, d)
            far = jnp.argmax(distance, axis=-1).astype(jnp.int32)
            return cent, distance, far

        init = (jnp.zeros((Bb, npoint), jnp.int32),
                jnp.full((Bb, Nn), 1e10, jnp.float32),
                jnp.zeros((Bb,), jnp.int32))
        return lax.fori_loop(0, npoint, body, init)[0]

    xyz_t = jnp.transpose(xyz, (0, 2, 1))
    fps_pal = pallas_fps(xyz_t, groups)
    fps_ref = ref_fps(xyz, groups)
    assert jnp.array_equal(fps_pal, fps_ref), "FPS index mismatch"

    nxyz = jnp.take_along_axis(xyz, fps_pal[:, :, None], axis=1)
    ctr = jnp.take_along_axis(points, fps_pal[:, :, None], axis=1)
    d_ref = jnp.sum((nxyz[:, :, None, :] - xyz[:, None, :, :]) ** 2, axis=-1)
    _, knn_ref = lax.top_k(-d_ref, kneighbors)
    grouped_ref = jax.vmap(lambda p, i: p[i])(points, knn_ref)
    ref_out = jnp.concatenate(
        [grouped_ref - ctr[:, :, None, :],
         jnp.broadcast_to(ctr[:, :, None, :], grouped_ref.shape)], axis=-1)

    assert jnp.allclose(new_xyz, nxyz)
    assert jnp.allclose(new_points, ref_out, atol=1e-4, rtol=1e-4)

    print("KERNEL_OK")
</pallas_src>

<mosaic_0001>
module attributes {stable_mosaic.version = 11 : i64} {
  func.func @_fps_kernel(%arg0: i32, %arg1: memref<1x3x64xf32, #tpu.memory_space<vmem>>, %arg2: memref<1x16x1xi32, #tpu.memory_space<vmem>>) attributes {dimension_semantics = [#tpu.dimension_semantics<parallel>], iteration_bounds = array<i64: 2>, scalar_prefetch = 0 : i64, scratch_operands = 0 : i64, tpu.core_type = #tpu.core_type<tc>, window_params = [{transform_indices = @transform_0, window_bounds = array<i64: 1, 3, 64>}, {transform_indices = @transform_1, window_bounds = array<i64: 1, 16, 1>}]} {
    %c0 = arith.constant 0 : index
    %c0_0 = arith.constant 0 : index
    %c0_1 = arith.constant 0 : index
    %0 = vector.load %arg1[%c0, %c0_0, %c0_1] : memref<1x3x64xf32, #tpu.memory_space<vmem>>, vector<1x3x64xf32>
    %1 = vector.shape_cast %0 : vector<1x3x64xf32> to vector<3x64xf32>
    %2 = vector.extract_strided_slice %1 {offsets = [0, 0], sizes = [1, 64], strides = [1, 1]} : vector<3x64xf32> to vector<1x64xf32>
    %3 = vector.extract_strided_slice %1 {offsets = [1, 0], sizes = [1, 64], strides = [1, 1]} : vector<3x64xf32> to vector<1x64xf32>
    %4 = vector.extract_strided_slice %1 {offsets = [2, 0], sizes = [1, 64], strides = [1, 1]} : vector<3x64xf32> to vector<1x64xf32>
    %5 = tpu.iota {dimensions = array<i32: 1>} : vector<1x64xi32>
    %6 = tpu.iota {dimensions = array<i32: 0>} : vector<16x1xi32>
    %cst = arith.constant 1.000000e+10 : f32
    %7 = vector.broadcast %cst : f32 to vector<1x64xf32>
    %c0_i32 = arith.constant 0 : i32
    %8 = vector.broadcast %c0_i32 : i32 to vector<16x1xi32>
    %c0_i32_2 = arith.constant 0 : i32
    %c0_i32_3 = arith.constant 0 : i32
    %c16_i32 = arith.constant 16 : i32
    %9 = arith.addi %c0_i32_3, %c16_i32 : i32
    %c1_i32 = arith.constant 1 : i32
    %10:3 = scf.for %arg3 = %c0_i32_3 to %9 step %c1_i32 iter_args(%arg4 = %c0_i32_2, %arg5 = %7, %arg6 = %8) -> (i32, vector<1x64xf32>, vector<16x1xi32>)  : i32 {
      %14 = vector.broadcast %arg3 : i32 to vector<16x1xi32>
      %15 = arith.cmpi eq, %6, %14 : vector<16x1xi32>
      %16 = vector.broadcast %arg4 : i32 to vector<16x1xi32>
      %17 = arith.select %15, %16, %arg6 : vector<16x1xi1>, vector<16x1xi32>
      %18 = vector.broadcast %arg4 : i32 to vector<1x64xi32>
      %19 = arith.cmpi eq, %5, %18 : vector<1x64xi32>
      %cst_8 = arith.constant 0.000000e+00 : f32
      %20 = vector.broadcast %cst_8 : f32 to vector<1x64xf32>
      %21 = arith.select %19, %2, %20 : vector<1x64xi1>, vector<1x64xf32>
      %22 = vector.shape_cast %21 : vector<1x64xf32> to vector<1x1x64xf32>
      %cst_9 = arith.constant dense<0.000000e+00> : vector<1xf32>
      %23 = vector.multi_reduction <add>, %22, %cst_9 [1, 2] : vector<1x1x64xf32> to vector<1xf32>
      %24 = vector.shape_cast %23 : vector<1xf32> to vector<1x1x1xf32>
      %25 = vector.extract %24[0, 0, 0] : f32 from vector<1x1x1xf32>
      %cst_10 = arith.constant 0.000000e+00 : f32
      %26 = vector.broadcast %cst_10 : f32 to vector<1x64xf32>
      %27 = arith.select %19, %3, %26 : vector<1x64xi1>, vector<1x64xf32>
      %28 = vector.shape_cast %27 : vector<1x64xf32> to vector<1x1x64xf32>
      %cst_11 = arith.constant dense<0.000000e+00> : vector<1xf32>
      %29 = vector.multi_reduction <add>, %28, %cst_11 [1, 2] : vector<1x1x64xf32> to vector<1xf32>
      %30 = vector.shape_cast %29 : vector<1xf32> to vector<1x1x1xf32>
      %31 = vector.extract %30[0, 0, 0] : f32 from vector<1x1x1xf32>
      %cst_12 = arith.constant 0.000000e+00 : f32
      %32 = vector.broadcast %cst_12 : f32 to vector<1x64xf32>
      %33 = arith.select %19, %4, %32 : vector<1x64xi1>, vector<1x64xf32>
      %34 = vector.shape_cast %33 : vector<1x64xf32> to vector<1x1x64xf32>
      %cst_13 = arith.constant dense<0.000000e+00> : vector<1xf32>
      %35 = vector.multi_reduction <add>, %34, %cst_13 [1, 2] : vector<1x1x64xf32> to vector<1xf32>
      %36 = vector.shape_cast %35 : vector<1xf32> to vector<1x1x1xf32>
      %37 = vector.extract %36[0, 0, 0] : f32 from vector<1x1x1xf32>
      %38 = vector.broadcast %25 : f32 to vector<1x64xf32>
      %39 = arith.subf %2, %38 : vector<1x64xf32>
      %40 = vector.broadcast %31 : f32 to vector<1x64xf32>
      %41 = arith.subf %3, %40 : vector<1x64xf32>
      %42 = vector.broadcast %37 : f32 to vector<1x64xf32>
      %43 = arith.subf %4, %42 : vector<1x64xf32>
      %44 = arith.mulf %39, %39 : vector<1x64xf32>
      %45 = arith.mulf %41, %41 : vector<1x64xf32>
      %46 = arith.addf %44, %45 : vector<1x64xf32>
      %47 = arith.mulf %43, %43 : vector<1x64xf32>
      %48 = arith.addf %46, %47 : vector<1x64xf32>
      %49 = arith.minimumf %arg5, %48 : vector<1x64xf32>
      %50 = vector.shape_cast %49 : vector<1x64xf32> to vector<1x1x64xf32>
      %cst_14 = arith.constant dense<0xFF800000> : vector<1xf32>
      %51 = vector.multi_reduction <maximumf>, %50, %cst_14 [1, 2] : vector<1x1x64xf32> to vector<1xf32>
      %52 = vector.shape_cast %51 : vector<1xf32> to vector<1x1x1xf32>
      %53 = vector.extract %52[0, 0, 0] : f32 from vector<1x1x1xf32>
      %54 = vector.broadcast %53 : f32 to vector<1x64xf32>
      %55 = arith.cmpf oeq, %49, %54 : vector<1x64xf32>
      %c64_i32 = arith.constant 64 : i32
      %56 = vector.broadcast %c64_i32 : i32 to vector<1x64xi32>
      %57 = arith.select %55, %5, %56 : vector<1x64xi1>, vector<1x64xi32>
      %58 = vector.shape_cast %57 : vector<1x64xi32> to vector<1x1x64xi32>
      %cst_15 = arith.constant dense<2147483647> : vector<1xi32>
      %59 = vector.multi_reduction <minsi>, %58, %cst_15 [1, 2] : vector<1x1x64xi32> to vector<1xi32>
      %60 = vector.shape_cast %59 : vector<1xi32> to vector<1x1x1xi32>
      %61 = vector.extract %60[0, 0, 0] : i32 from vector<1x1x1xi32>
      scf.yield %61, %49, %17 : i32, vector<1x64xf32>, vector<16x1xi32>
    }
    %c16_i32_4 = arith.constant 16 : i32
    %c0_5 = arith.constant 0 : index
    %c0_6 = arith.constant 0 : index
    %c0_7 = arith.constant 0 : index
    %11 = vector.load %arg2[%c0_5, %c0_6, %c0_7] : memref<1x16x1xi32, #tpu.memory_space<vmem>>, vector<1x16x1xi32>
    %12 = vector.shape_cast %11 : vector<1x16x1xi32> to vector<16x1xi32>
    %13 = vector.shape_cast %10#2 : vector<16x1xi32> to vector<1x16x1xi32>
    tpu.vector_store %arg2[%c0_5, %c0_6, %c0_7], %13 {strides = array<i32>} : memref<1x16x1xi32, #tpu.memory_space<vmem>>, vector<1x16x1xi32>,
    return
  }
  func.func @transform_0(%arg0: i32) -> (i32, i32, i32) {
    %c0_i32 = arith.constant 0 : i32
    %c0_i32_0 = arith.constant 0 : i32
    %c0_i32_1 = arith.constant 0 : i32
    return %arg0, %c0_i32, %c0_i32_0 : i32, i32, i32
  }
  func.func @transform_1(%arg0: i32) -> (i32, i32, i32) {
    %c0_i32 = arith.constant 0 : i32
    %c0_i32_0 = arith.constant 0 : i32
    %c0_i32_1 = arith.constant 0 : i32
    return %arg0, %c0_i32, %c0_i32_0 : i32, i32, i32
  }
}

module attributes {stable_mosaic.version = 11 : i64} {
  func.func @_knn_group_kernel(%arg0: i32, %arg1: i32, %arg2: memref<1x16x3xf32, #tpu.memory_space<vmem>>, %arg3: memref<1x3x64xf32, #tpu.memory_space<vmem>>, %arg4: memref<1x64x16xf32, #tpu.memory_space<vmem>>, %arg5: memref<1x16x16xf32, #tpu.memory_space<vmem>>, %arg6: memref<1x16x8x32xf32, #tpu.memory_space<vmem>>) attributes {dimension_semantics = [#tpu.dimension_semantics<parallel>, #tpu.dimension_semantics<parallel>], iteration_bounds = array<i64: 2, 1>, scalar_prefetch = 0 : i64, scratch_operands = 0 : i64, tpu.core_type = #tpu.core_type<tc>, window_params = [{transform_indices = @transform_0, window_bounds = array<i64: 1, 16, 3>}, {transform_indices = @transform_1, window_bounds = array<i64: 1, 3, 64>}, {transform_indices = @transform_2, window_bounds = array<i64: 1, 64, 16>}, {transform_indices = @transform_3, window_bounds = array<i64: 1, 16, 16>}, {transform_indices = @transform_4, window_bounds = array<i64: 1, 16, 8, 32>}]} {
    %c0 = arith.constant 0 : index
    %c0_0 = arith.constant 0 : index
    %c0_1 = arith.constant 0 : index
    %0 = vector.load %arg2[%c0, %c0_0, %c0_1] : memref<1x16x3xf32, #tpu.memory_space<vmem>>, vector<1x16x3xf32>
    %1 = vector.shape_cast %0 : vector<1x16x3xf32> to vector<16x3xf32>
    %c0_2 = arith.constant 0 : index
    %c0_3 = arith.constant 0 : index
    %c0_4 = arith.constant 0 : index
    %2 = vector.load %arg3[%c0_2, %c0_3, %c0_4] : memref<1x3x64xf32, #tpu.memory_space<vmem>>, vector<1x3x64xf32>
    %3 = vector.shape_cast %2 : vector<1x3x64xf32> to vector<3x64xf32>
    %c0_5 = arith.constant 0 : index
    %c0_6 = arith.constant 0 : index
    %c0_7 = arith.constant 0 : index
    %4 = vector.load %arg4[%c0_5, %c0_6, %c0_7] : memref<1x64x16xf32, #tpu.memory_space<vmem>>, vector<1x64x16xf32>
    %5 = vector.shape_cast %4 : vector<1x64x16xf32> to vector<64x16xf32>
    %c0_8 = arith.constant 0 : index
    %c0_9 = arith.constant 0 : index
    %c0_10 = arith.constant 0 : index
    %6 = vector.load %arg5[%c0_8, %c0_9, %c0_10] : memref<1x16x16xf32, #tpu.memory_space<vmem>>, vector<1x16x16xf32>
    %7 = vector.shape_cast %6 : vector<1x16x16xf32> to vector<16x16xf32>
    %cst = arith.constant 0.000000e+00 : f32
    %8 = vector.broadcast %cst : f32 to vector<16x64xf32>
    %9 = vector.extract_strided_slice %1 {offsets = [0, 0], sizes = [16, 1], strides = [1, 1]} : vector<16x3xf32> to vector<16x1xf32>
    %10 = vector.extract_strided_slice %3 {offsets = [0, 0], sizes = [1, 64], strides = [1, 1]} : vector<3x64xf32> to vector<1x64xf32>
    %11 = vector.broadcast %9 : vector<16x1xf32> to vector<16x64xf32>
    %12 = vector.broadcast %10 : vector<1x64xf32> to vector<16x64xf32>
    %13 = arith.subf %11, %12 : vector<16x64xf32>
    %14 = arith.mulf %13, %13 : vector<16x64xf32>
    %15 = arith.addf %8, %14 : vector<16x64xf32>
    %16 = vector.extract_strided_slice %1 {offsets = [0, 1], sizes = [16, 1], strides = [1, 1]} : vector<16x3xf32> to vector<16x1xf32>
    %17 = vector.extract_strided_slice %3 {offsets = [1, 0], sizes = [1, 64], strides = [1, 1]} : vector<3x64xf32> to vector<1x64xf32>
    %18 = vector.broadcast %16 : vector<16x1xf32> to vector<16x64xf32>
    %19 = vector.broadcast %17 : vector<1x64xf32> to vector<16x64xf32>
    %20 = arith.subf %18, %19 : vector<16x64xf32>
    %21 = arith.mulf %20, %20 : vector<16x64xf32>
    %22 = arith.addf %15, %21 : vector<16x64xf32>
    %23 = vector.extract_strided_slice %1 {offsets = [0, 2], sizes = [16, 1], strides = [1, 1]} : vector<16x3xf32> to vector<16x1xf32>
    %24 = vector.extract_strided_slice %3 {offsets = [2, 0], sizes = [1, 64], strides = [1, 1]} : vector<3x64xf32> to vector<1x64xf32>
    %25 = vector.broadcast %23 : vector<16x1xf32> to vector<16x64xf32>
    %26 = vector.broadcast %24 : vector<1x64xf32> to vector<16x64xf32>
    %27 = arith.subf %25, %26 : vector<16x64xf32>
    %28 = arith.mulf %27, %27 : vector<16x64xf32>
    %29 = arith.addf %22, %28 : vector<16x64xf32>
    %30 = tpu.iota {dimensions = array<i32: 1>} : vector<16x64xi32>
    %31 = tpu.iota {dimensions = array<i32: 1>} : vector<16x8x1xi32>
    %cst_11 = arith.constant 0.000000e+00 : f32
    %32 = vector.broadcast %cst_11 : f32 to vector<16x8x16xf32>
    %cst_12 = arith.constant dense<0x7F800000> : vector<16xf32>
    %33 = vector.multi_reduction <minimumf>, %29, %cst_12 [1] : vector<16x64xf32> to vector<16xf32>
    %34 = vector.shape_cast %33 : vector<16xf32> to vector<16x1xf32>
    %35 = vector.broadcast %34 : vector<16x1xf32> to vector<16x64xf32>
    %36 = arith.cmpf oeq, %29, %35 : vector<16x64xf32>
    %c64_i32 = arith.constant 64 : i32
    %37 = vector.broadcast %c64_i32 : i32 to vector<16x64xi32>
    %38 = arith.select %36, %30, %37 : vector<16x64xi1>, vector<16x64xi32>
    %cst_13 = arith.constant dense<2147483647> : vector<16xi32>
    %39 = vector.multi_reduction <minsi>, %38, %cst_13 [1] : vector<16x64xi32> to vector<16xi32>
    %40 = vector.shape_cast %39 : vector<16xi32> to vector<16x1xi32>
    %41 = vector.broadcast %40 : vector<16x1xi32> to vector<16x64xi32>
    %42 = arith.cmpi eq, %30, %41 : vector<16x64xi32>
    %43 = arith.extui %42 : vector<16x64xi1> to vector<16x64xi32>
    %44 = arith.sitofp %43 : vector<16x64xi32> to vector<16x64xf32>
    %cst_14 = arith.constant dense<0.000000e+00> : vector<16x16xf32>
    %45 = tpu.matmul %44, %5, %cst_14 {dimension_numbers = #tpu.dot_dimension_numbers<[1], [0], [0], [1], [0, 0, 1, 1], [], []>} : vector<16x64xf32>, vector<64x16xf32>, vector<16x16xf32> -> vector<16x16xf32>
    %c0_i32 = arith.constant 0 : i32
    %46 = vector.broadcast %c0_i32 : i32 to vector<16x8x1xi32>
    %47 = arith.cmpi eq, %31, %46 : vector<16x8x1xi32>
    %48 = vector.shape_cast %45 : vector<16x16xf32> to vector<16x1x16xf32>
    %49 = vector.shape_cast %47 : vector<16x8x1xi1> to vector<16x8x1xi1>
    %50 = vector.broadcast %49 : vector<16x8x1xi1> to vector<16x8x16xi1>
    %51 = vector.shape_cast %48 : vector<16x1x16xf32> to vector<16x1x16xf32>
    %52 = vector.broadcast %51 : vector<16x1x16xf32> to vector<16x8x16xf32>
    %53 = arith.select %50, %52, %32 : vector<16x8x16xi1>, vector<16x8x16xf32>
    %cst_15 = arith.constant 0x7F800000 : f32
    %54 = vector.broadcast %cst_15 : f32 to vector<16x64xf32>
    %55 = arith.select %42, %54, %29 : vector<16x64xi1>, vector<16x64xf32>
    %cst_16 = arith.constant dense<0x7F800000> : vector<16xf32>
    %56 = vector.multi_reduction <minimumf>, %55, %cst_16 [1] : vector<16x64xf32> to vector<16xf32>
    %57 = vector.shape_cast %56 : vector<16xf32> to vector<16x1xf32>
    %58 = vector.broadcast %57 : vector<16x1xf32> to vector<16x64xf32>
    %59 = arith.cmpf oeq, %55, %58 : vector<16x64xf32>
    %c64_i32_17 = arith.constant 64 : i32
    %60 = vector.broadcast %c64_i32_17 : i32 to vector<16x64xi32>
    %61 = arith.select %59, %30, %60 : vector<16x64xi1>, vector<16x64xi32>
    %cst_18 = arith.constant dense<2147483647> : vector<16xi32>
    %62 = vector.multi_reduction <minsi>, %61, %cst_18 [1] : vector<16x64xi32> to vector<16xi32>
    %63 = vector.shape_cast %62 : vector<16xi32> to vector<16x1xi32>
    %64 = vector.broadcast %63 : vector<16x1xi32> to vector<16x64xi32>
    %65 = arith.cmpi eq, %30, %64 : vector<16x64xi32>
    %66 = arith.extui %65 : vector<16x64xi1> to vector<16x64xi32>
    %67 = arith.sitofp %66 : vector<16x64xi32> to vector<16x64xf32>
    %cst_19 = arith.constant dense<0.000000e+00> : vector<16x16xf32>
    %68 = tpu.matmul %67, %5, %cst_19 {dimension_numbers = #tpu.dot_dimension_numbers<[1], [0], [0], [1], [0, 0, 1, 1], [], []>} : vector<16x64xf32>, vector<64x16xf32>, vector<16x16xf32> -> vector<16x16xf32>
    %c1_i32 = arith.constant 1 : i32
    %69 = vector.broadcast %c1_i32 : i32 to vector<16x8x1xi32>
    %70 = arith.cmpi eq, %31, %69 : vector<16x8x1xi32>
    %71 = vector.shape_cast %68 : vector<16x16xf32> to vector<16x1x16xf32>
    %72 = vector.shape_cast %70 : vector<16x8x1xi1> to vector<16x8x1xi1>
    %73 = vector.broadcast %72 : vector<16x8x1xi1> to vector<16x8x16xi1>
    %74 = vector.shape_cast %71 : vector<16x1x16xf32> to vector<16x1x16xf32>
    %75 = vector.broadcast %74 : vector<16x1x16xf32> to vector<16x8x16xf32>
    %76 = arith.select %73, %75, %53 : vector<16x8x16xi1>, vector<16x8x16xf32>
    %cst_20 = arith.constant 0x7F800000 : f32
    %77 = vector.broadcast %cst_20 : f32 to vector<16x64xf32>
    %78 = arith.select %65, %77, %55 : vector<16x64xi1>, vector<16x64xf32>
    %cst_21 = arith.constant dense<0x7F800000> : vector<16xf32>
    %79 = vector.multi_reduction <minimumf>, %78, %cst_21 [1] : vector<16x64xf32> to vector<16xf32>
    %80 = vector.shape_cast %79 : vector<16xf32> to vector<16x1xf32>
    %81 = vector.broadcast %80 : vector<16x1xf32> to vector<16x64xf32>
    %82 = arith.cmpf oeq, %78, %81 : vector<16x64xf32>
    %c64_i32_22 = arith.constant 64 : i32
    %83 = vector.broadcast %c64_i32_22 : i32 to vector<16x64xi32>
    %84 = arith.select %82, %30, %83 : vector<16x64xi1>, vector<16x64xi32>
    %cst_23 = arith.constant dense<2147483647> : vector<16xi32>
    %85 = vector.multi_reduction <minsi>, %84, %cst_23 [1] : vector<16x64xi32> to vector<16xi32>
    %86 = vector.shape_cast %85 : vector<16xi32> to vector<16x1xi32>
    %87 = vector.broadcast %86 : vector<16x1xi32> to vector<16x64xi32>
    %88 = arith.cmpi eq, %30, %87 : vector<16x64xi32>
    %89 = arith.extui %88 : vector<16x64xi1> to vector<16x64xi32>
    %90 = arith.sitofp %89 : vector<16x64xi32> to vector<16x64xf32>
    %cst_24 = arith.constant dense<0.000000e+00> : vector<16x16xf32>
    %91 = tpu.matmul %90, %5, %cst_24 {dimension_numbers = #tpu.dot_dimension_numbers<[1], [0], [0], [1], [0, 0, 1, 1], [], []>} : vector<16x64xf32>, vector<64x16xf32>, vector<16x16xf32> -> vector<16x16xf32>
    %c2_i32 = arith.constant 2 : i32
    %92 = vector.broadcast %c2_i32 : i32 to vector<16x8x1xi32>
    %93 = arith.cmpi eq, %31, %92 : vector<16x8x1xi32>
    %94 = vector.shape_cast %91 : vector<16x16xf32> to vector<16x1x16xf32>
    %95 = vector.shape_cast %93 : vector<16x8x1xi1> to vector<16x8x1xi1>
    %96 = vector.broadcast %95 : vector<16x8x1xi1> to vector<16x8x16xi1>
    %97 = vector.shape_cast %94 : vector<16x1x16xf32> to vector<16x1x16xf32>
    %98 = vector.broadcast %97 : vector<16x1x16xf32> to vector<16x8x16xf32>
    %99 = arith.select %96, %98, %76 : vector<16x8x16xi1>, vector<16x8x16xf32>
    %cst_25 = arith.constant 0x7F800000 : f32
    %100 = vector.broadcast %cst_25 : f32 to vector<16x64xf32>
    %101 = arith.select %88, %100, %78 : vector<16x64xi1>, vector<16x64xf32>
    %cst_26 = arith.constant dense<0x7F800000> : vector<16xf32>
    %102 = vector.multi_reduction <minimumf>, %101, %cst_26 [1] : vector<16x64xf32> to vector<16xf32>
    %103 = vector.shape_cast %102 : vector<16xf32> to vector<16x1xf32>
    %104 = vector.broadcast %103 : vector<16x1xf32> to vector<16x64xf32>
    %105 = arith.cmpf oeq, %101, %104 : vector<16x64xf32>
    %c64_i32_27 = arith.constant 64 : i32
    %106 = vector.broadcast %c64_i32_27 : i32 to vector<16x64xi32>
    %107 = arith.select %105, %30, %106 : vector<16x64xi1>, vector<16x64xi32>
    %cst_28 = arith.constant dense<2147483647> : vector<16xi32>
    %108 = vector.multi_reduction <minsi>, %107, %cst_28 [1] : vector<16x64xi32> to vector<16xi32>
    %109 = vector.shape_cast %108 : vector<16xi32> to vector<16x1xi32>
    %110 = vector.broadcast %109 : vector<16x1xi32> to vector<16x64xi32>
    %111 = arith.cmpi eq, %30, %110 : vector<16x64xi32>
    %112 = arith.extui %111 : vector<16x64xi1> to vector<16x64xi32>
    %113 = arith.sitofp %112 : vector<16x64xi32> to vector<16x64xf32>
    %cst_29 = arith.constant dense<0.000000e+00> : vector<16x16xf32>
    %114 = tpu.matmul %113, %5, %cst_29 {dimension_numbers = #tpu.dot_dimension_numbers<[1], [0], [0], [1], [0, 0, 1, 1], [], []>} : vector<16x64xf32>, vector<64x16xf32>, vector<16x16xf32> -> vector<16x16xf32>
    %c3_i32 = arith.constant 3 : i32
    %115 = vector.broadcast %c3_i32 : i32 to vector<16x8x1xi32>
    %116 = arith.cmpi eq, %31, %115 : vector<16x8x1xi32>
    %117 = vector.shape_cast %114 : vector<16x16xf32> to vector<16x1x16xf32>
    %118 = vector.shape_cast %116 : vector<16x8x1xi1> to vector<16x8x1xi1>
    %119 = vector.broadcast %118 : vector<16x8x1xi1> to vector<16x8x16xi1>
    %120 = vector.shape_cast %117 : vector<16x1x16xf32> to vector<16x1x16xf32>
    %121 = vector.broadcast %120 : vector<16x1x16xf32> to vector<16x8x16xf32>
    %122 = arith.select %119, %121, %99 : vector<16x8x16xi1>, vector<16x8x16xf32>
    %cst_30 = arith.constant 0x7F800000 : f32
    %123 = vector.broadcast %cst_30 : f32 to vector<16x64xf32>
    %124 = arith.select %111, %123, %101 : vector<16x64xi1>, vector<16x64xf32>
    %cst_31 = arith.constant dense<0x7F800000> : vector<16xf32>
    %125 = vector.multi_reduction <minimumf>, %124, %cst_31 [1] : vector<16x64xf32> to vector<16xf32>
    %126 = vector.shape_cast %125 : vector<16xf32> to vector<16x1xf32>
    %127 = vector.broadcast %126 : vector<16x1xf32> to vector<16x64xf32>
    %128 = arith.cmpf oeq, %124, %127 : vector<16x64xf32>
    %c64_i32_32 = arith.constant 64 : i32
    %129 = vector.broadcast %c64_i32_32 : i32 to vector<16x64xi32>
    %130 = arith.select %128, %30, %129 : vector<16x64xi1>, vector<16x64xi32>
    %cst_33 = arith.constant dense<2147483647> : vector<16xi32>
    %131 = vector.multi_reduction <minsi>, %130, %cst_33 [1] : vector<16x64xi32> to vector<16xi32>
    %132 = vector.shape_cast %131 : vector<16xi32> to vector<16x1xi32>
    %133 = vector.broadcast %132 : vector<16x1xi32> to vector<16x64xi32>
    %134 = arith.cmpi eq, %30, %133 : vector<16x64xi32>
    %135 = arith.extui %134 : vector<16x64xi1> to vector<16x64xi32>
    %136 = arith.sitofp %135 : vector<16x64xi32> to vector<16x64xf32>
    %cst_34 = arith.constant dense<0.000000e+00> : vector<16x16xf32>
    %137 = tpu.matmul %136, %5, %cst_34 {dimension_numbers = #tpu.dot_dimension_numbers<[1], [0], [0], [1], [0, 0, 1, 1], [], []>} : vector<16x64xf32>, vector<64x16xf32>, vector<16x16xf32> -> vector<16x16xf32>
    %c4_i32 = arith.constant 4 : i32
    %138 = vector.broadcast %c4_i32 : i32 to vector<16x8x1xi32>
    %139 = arith.cmpi eq, %31, %138 : vector<16x8x1xi32>
    %140 = vector.shape_cast %137 : vector<16x16xf32> to vector<16x1x16xf32>
    %141 = vector.shape_cast %139 : vector<16x8x1xi1> to vector<16x8x1xi1>
    %142 = vector.broadcast %141 : vector<16x8x1xi1> to vector<16x8x16xi1>
    %143 = vector.shape_cast %140 : vector<16x1x16xf32> to vector<16x1x16xf32>
    %144 = vector.broadcast %143 : vector<16x1x16xf32> to vector<16x8x16xf32>
    %145 = arith.select %142, %144, %122 : vector<16x8x16xi1>, vector<16x8x16xf32>
    %cst_35 = arith.constant 0x7F800000 : f32
    %146 = vector.broadcast %cst_35 : f32 to vector<16x64xf32>
    %147 = arith.select %134, %146, %124 : vector<16x64xi1>, vector<16x64xf32>
    %cst_36 = arith.constant dense<0x7F800000> : vector<16xf32>
    %148 = vector.multi_reduction <minimumf>, %147, %cst_36 [1] : vector<16x64xf32> to vector<16xf32>
    %149 = vector.shape_cast %148 : vector<16xf32> to vector<16x1xf32>
    %150 = vector.broadcast %149 : vector<16x1xf32> to vector<16x64xf32>
    %151 = arith.cmpf oeq, %147, %150 : vector<16x64xf32>
    %c64_i32_37 = arith.constant 64 : i32
    %152 = vector.broadcast %c64_i32_37 : i32 to vector<16x64xi32>
    %153 = arith.select %151, %30, %152 : vector<16x64xi1>, vector<16x64xi32>
    %cst_38 = arith.constant dense<2147483647> : vector<16xi32>
    %154 = vector.multi_reduction <minsi>, %153, %cst_38 [1] : vector<16x64xi32> to vector<16xi32>
    %155 = vector.shape_cast %154 : vector<16xi32> to vector<16x1xi32>
    %156 = vector.broadcast %155 : vector<16x1xi32> to vector<16x64xi32>
    %157 = arith.cmpi eq, %30, %156 : vector<16x64xi32>
    %158 = arith.extui %157 : vector<16x64xi1> to vector<16x64xi32>
    %159 = arith.sitofp %158 : vector<16x64xi32> to vector<16x64xf32>
    %cst_39 = arith.constant dense<0.000000e+00> : vector<16x16xf32>
    %160 = tpu.matmul %159, %5, %cst_39 {dimension_numbers = #tpu.dot_dimension_numbers<[1], [0], [0], [1], [0, 0, 1, 1], [], []>} : vector<16x64xf32>, vector<64x16xf32>, vector<16x16xf32> -> vector<16x16xf32>
    %c5_i32 = arith.constant 5 : i32
    %161 = vector.broadcast %c5_i32 : i32 to vector<16x8x1xi32>
    %162 = arith.cmpi eq, %31, %161 : vector<16x8x1xi32>
    %163 = vector.shape_cast %160 : vector<16x16xf32> to vector<16x1x16xf32>
    %164 = vector.shape_cast %162 : vector<16x8x1xi1> to vector<16x8x1xi1>
    %165 = vector.broadcast %164 : vector<16x8x1xi1> to vector<16x8x16xi1>
    %166 = vector.shape_cast %163 : vector<16x1x16xf32> to vector<16x1x16xf32>
    %167 = vector.broadcast %166 : vector<16x1x16xf32> to vector<16x8x16xf32>
    %168 = arith.select %165, %167, %145 : vector<16x8x16xi1>, vector<16x8x16xf32>
    %cst_40 = arith.constant 0x7F800000 : f32
    %169 = vector.broadcast %cst_40 : f32 to vector<16x64xf32>
    %170 = arith.select %157, %169, %147 : vector<16x64xi1>, vector<16x64xf32>
    %cst_41 = arith.constant dense<0x7F800000> : vector<16xf32>
    %171 = vector.multi_reduction <minimumf>, %170, %cst_41 [1] : vector<16x64xf32> to vector<16xf32>
    %172 = vector.shape_cast %171 : vector<16xf32> to vector<16x1xf32>
    %173 = vector.broadcast %172 : vector<16x1xf32> to vector<16x64xf32>
    %174 = arith.cmpf oeq, %170, %173 : vector<16x64xf32>
    %c64_i32_42 = arith.constant 64 : i32
    %175 = vector.broadcast %c64_i32_42 : i32 to vector<16x64xi32>
    %176 = arith.select %174, %30, %175 : vector<16x64xi1>, vector<16x64xi32>
    %cst_43 = arith.constant dense<2147483647> : vector<16xi32>
    %177 = vector.multi_reduction <minsi>, %176, %cst_43 [1] : vector<16x64xi32> to vector<16xi32>
    %178 = vector.shape_cast %177 : vector<16xi32> to vector<16x1xi32>
    %179 = vector.broadcast %178 : vector<16x1xi32> to vector<16x64xi32>
    %180 = arith.cmpi eq, %30, %179 : vector<16x64xi32>
    %181 = arith.extui %180 : vector<16x64xi1> to vector<16x64xi32>
    %182 = arith.sitofp %181 : vector<16x64xi32> to vector<16x64xf32>
    %cst_44 = arith.constant dense<0.000000e+00> : vector<16x16xf32>
    %183 = tpu.matmul %182, %5, %cst_44 {dimension_numbers = #tpu.dot_dimension_numbers<[1], [0], [0], [1], [0, 0, 1, 1], [], []>} : vector<16x64xf32>, vector<64x16xf32>, vector<16x16xf32> -> vector<16x16xf32>
    %c6_i32 = arith.constant 6 : i32
    %184 = vector.broadcast %c6_i32 : i32 to vector<16x8x1xi32>
    %185 = arith.cmpi eq, %31, %184 : vector<16x8x1xi32>
    %186 = vector.shape_cast %183 : vector<16x16xf32> to vector<16x1x16xf32>
    %187 = vector.shape_cast %185 : vector<16x8x1xi1> to vector<16x8x1xi1>
    %188 = vector.broadcast %187 : vector<16x8x1xi1> to vector<16x8x16xi1>
    %189 = vector.shape_cast %186 : vector<16x1x16xf32> to vector<16x1x16xf32>
    %190 = vector.broadcast %189 : vector<16x1x16xf32> to vector<16x8x16xf32>
    %191 = arith.select %188, %190, %168 : vector<16x8x16xi1>, vector<16x8x16xf32>
    %cst_45 = arith.constant 0x7F800000 : f32
    %192 = vector.broadcast %cst_45 : f32 to vector<16x64xf32>
    %193 = arith.select %180, %192, %170 : vector<16x64xi1>, vector<16x64xf32>
    %cst_46 = arith.constant dense<0x7F800000> : vector<16xf32>
    %194 = vector.multi_reduction <minimumf>, %193, %cst_46 [1] : vector<16x64xf32> to vector<16xf32>
    %195 = vector.shape_cast %194 : vector<16xf32> to vector<16x1xf32>
    %196 = vector.broadcast %195 : vector<16x1xf32> to vector<16x64xf32>
    %197 = arith.cmpf oeq, %193, %196 : vector<16x64xf32>
    %c64_i32_47 = arith.constant 64 : i32
    %198 = vector.broadcast %c64_i32_47 : i32 to vector<16x64xi32>
    %199 = arith.select %197, %30, %198 : vector<16x64xi1>, vector<16x64xi32>
    %cst_48 = arith.constant dense<2147483647> : vector<16xi32>
    %200 = vector.multi_reduction <minsi>, %199, %cst_48 [1] : vector<16x64xi32> to vector<16xi32>
    %201 = vector.shape_cast %200 : vector<16xi32> to vector<16x1xi32>
    %202 = vector.broadcast %201 : vector<16x1xi32> to vector<16x64xi32>
    %203 = arith.cmpi eq, %30, %202 : vector<16x64xi32>
    %204 = arith.extui %203 : vector<16x64xi1> to vector<16x64xi32>
    %205 = arith.sitofp %204 : vector<16x64xi32> to vector<16x64xf32>
    %cst_49 = arith.constant dense<0.000000e+00> : vector<16x16xf32>
    %206 = tpu.matmul %205, %5, %cst_49 {dimension_numbers = #tpu.dot_dimension_numbers<[1], [0], [0], [1], [0, 0, 1, 1], [], []>} : vector<16x64xf32>, vector<64x16xf32>, vector<16x16xf32> -> vector<16x16xf32>
    %c7_i32 = arith.constant 7 : i32
    %207 = vector.broadcast %c7_i32 : i32 to vector<16x8x1xi32>
    %208 = arith.cmpi eq, %31, %207 : vector<16x8x1xi32>
    %209 = vector.shape_cast %206 : vector<16x16xf32> to vector<16x1x16xf32>
    %210 = vector.shape_cast %208 : vector<16x8x1xi1> to vector<16x8x1xi1>
    %211 = vector.broadcast %210 : vector<16x8x1xi1> to vector<16x8x16xi1>
    %212 = vector.shape_cast %209 : vector<16x1x16xf32> to vector<16x1x16xf32>
    %213 = vector.broadcast %212 : vector<16x1x16xf32> to vector<16x8x16xf32>
    %214 = arith.select %211, %213, %191 : vector<16x8x16xi1>, vector<16x8x16xf32>
    %215 = vector.shape_cast %7 : vector<16x16xf32> to vector<16x1x16xf32>
    %216 = vector.broadcast %215 : vector<16x1x16xf32> to vector<16x8x16xf32>
    %217 = arith.subf %214, %216 : vector<16x8x16xf32>
    %c0_50 = arith.constant 0 : index
    %c0_51 = arith.constant 0 : index
    %c0_52 = arith.constant 0 : index
    %c0_53 = arith.constant 0 : index
    %218 = vector.load %arg6[%c0_50, %c0_51, %c0_52, %c0_53] : memref<1x16x8x32xf32, #tpu.memory_space<vmem>>, vector<1x16x8x16xf32>
    %219 = vector.shape_cast %218 : vector<1x16x8x16xf32> to vector<16x8x16xf32>
    %220 = vector.shape_cast %217 : vector<16x8x16xf32> to vector<1x16x8x16xf32>
    tpu.vector_store %arg6[%c0_50, %c0_51, %c0_52, %c0_53], %220 {strides = array<i32>} : memref<1x16x8x32xf32, #tpu.memory_space<vmem>>, vector<1x16x8x16xf32>,
    %221 = vector.shape_cast %7 : vector<16x16xf32> to vector<16x1x16xf32>
    %222 = vector.shape_cast %221 : vector<16x1x16xf32> to vector<16x1x16xf32>
    %223 = vector.broadcast %222 : vector<16x1x16xf32> to vector<16x8x16xf32>
    %c0_54 = arith.constant 0 : index
    %c0_55 = arith.constant 0 : index
    %c0_56 = arith.constant 0 : index
    %c16 = arith.constant 16 : index
    %224 = vector.load %arg6[%c0_54, %c0_55, %c0_56, %c16] : memref<1x16x8x32xf32, #tpu.memory_space<vmem>>, vector<1x16x8x16xf32>
    %225 = vector.shape_cast %224 : vector<1x16x8x16xf32> to vector<16x8x16xf32>
    %226 = vector.shape_cast %223 : vector<16x8x16xf32> to vector<1x16x8x16xf32>
    tpu.vector_store %arg6[%c0_54, %c0_55, %c0_56, %c16], %226 {strides = array<i32>} : memref<1x16x8x32xf32, #tpu.memory_space<vmem>>, vector<1x16x8x16xf32>,
    return
  }
  func.func @transform_0(%arg0: i32, %arg1: i32) -> (i32, i32, i32) {
    %c0_i32 = arith.constant 0 : i32
    %c0_i32_0 = arith.constant 0 : i32
    return %arg0, %arg1, %c0_i32 : i32, i32, i32
  }
  func.func @transform_1(%arg0: i32, %arg1: i32) -> (i32, i32, i32) {
    %c0_i32 = arith.constant 0 : i32
    %c0_i32_0 = arith.constant 0 : i32
    %c0_i32_1 = arith.constant 0 : i32
    return %arg0, %c0_i32, %c0_i32_0 : i32, i32, i32
  }
  func.func @transform_2(%arg0: i32, %arg1: i32) -> (i32, i32, i32) {
    %c0_i32 = arith.constant 0 : i32
    %c0_i32_0 = arith.constant 0 : i32
    %c0_i32_1 = arith.constant 0 : i32
    return %arg0, %c0_i32, %c0_i32_0 : i32, i32, i32
  }
  func.func @transform_3(%arg0: i32, %arg1: i32) -> (i32, i32, i32) {
    %c0_i32 = arith.constant 0 : i32
    %c0_i32_0 = arith.constant 0 : i32
    return %arg0, %arg1, %c0_i32 : i32, i32, i32
  }
  func.func @transform_4(%arg0: i32, %arg1: i32) -> (i32, i32, i32, i32) {
    %c0_i32 = arith.constant 0 : i32
    %c0_i32_0 = arith.constant 0 : i32
    %c0_i32_1 = arith.constant 0 : i32
    return %arg0, %arg1, %c0_i32, %c0_i32_0 : i32, i32, i32, i32
  }
}

</mosaic_0001>

<bundles_post_ra>
// kernel: _lambda_.2
= control target key start
LH: loop header
LB: loop body
LE: loop exit
PB: predicated region body
PF: predicated region fallthrough
CT: control target
= control target key end

     0   :  { %s432_s6 = smov 0   ;;  %s512_s0 = inlined_call_operand.vmem [shape: f32[2,3,64], index: 0, kind: input, shape index: {}]   ;;  %s513_s1 = inlined_call_operand.vmem [shape: s32[2,16,1], index: 1, kind: output, shape index: {}]  }
   0x1 LB: > { %s305_s7 = sadd.s32 4294967295, %s400_s6   ;;  %p309_p0 = scmp.ge.s32.totalorder %s400_s6, 1  ;;  %s400_s6 = sphi %s432_s6, %s11_s6  }
   0x2   : > { %p86_p1 = scmp.lt.s32.totalorder %s400_s6, 3 }
   0x4   : > { %p87_p2 = pnand %p309_p0, %p86_p1 }
   0x5   : > { %p105_p3 = scmp.lt.s32.totalorder (!%p87_p2), %s305_s7, 1  ;;  %s463_s16 = smov (!%p87_p2), 0  }
   0x6   : > { %90 = sbr.rel (%p87_p2) target bundleno = 790 (0x316), region = 24  ;;  %s465_s17 = smov (!%p87_p2), 0  }
   0xb   : > { %v115_v0 = vlaneseq  ;;  %s519_s7 = smov (!%p105_p3, %s305_s7), 1  ;;  %v457_v5 = vmov 0   ;;  %v459_v6 = vmov 0   ;;  %v461_v7 = vmov 1e+10  }
   0xc   : > { %s310_s8 = sshll.u32 %s519_s7, 2  ;;  %s315_s9 = sshll.u32 %s519_s7, 4 }
   0xd   : > { %v440_v1 = vand.u32 127, %v115_v0  ;;  %v442_v2 = vshrl.u32 %v115_v0, 7  ;;  %s108_s12 = scalar_lea.vmem %s512_s0, %s310_s8  ;;  %s453_s15 = scalar_lea.vmem %s513_s1, %s315_s9 }
   0xe   : > { %v455_v4 = vld [vmem:[%s108_s12] sm:$0x7] }
   0xf   : > { %v445_v3 = vadd.s32 8, %v442_v2 }
  0x10 LB: >> { %v130_v8 = vstv %s420_s17  ;;  %v133_v9 = vstv %s416_s16  ;;  %vm138_vm0 = vcmask 516096   ;;  %s125_s17 = sadd.s32 1, %s420_s17   ;;  %s420_s17 = sphi %s465_s17, %s125_s17   ;;  %s416_s16 = sphi %s463_s16, %s325_s16   ;;  %v412_v7 = vphi %v461_v7, %v191_v7   ;;  %v408_v6 = vphi %v459_v6, %v517_v6   ;;  %v404_v5 = vphi %v457_v5, %v516_v5  }
  0x11   : >> { %vm131_vm1 = vcmp.eq.s32.totalorder %v442_v2, %v130_v8  ;;  %vm132_vm2 = vcmp.eq.s32.totalorder %v445_v3, %v130_v8  ;;  %vm136_vm3 = vcmp.eq.s32.totalorder %v440_v1, %v133_v9  ;;  %p122_p4 = scmp.ge.s32.totalorder %s125_s17, 16  }
  0x12   : >> { %v137_v10 = vsel %vm136_vm3, %v455_v4, 0.0  ;;  %v479_v6 = vsel %vm131_vm1, %v133_v9, %v408_v6   ;;  %v481_v5 = vsel %vm132_vm2, %v133_v9, %v404_v5   ;;  %vm230_vm9 = vcmask (%p122_p4), 7168  }
  0x13   : >> { %v514_v11 = vmov %v479_v6  ;;  %v515_v12 = vmov %v481_v5  ;;  %v139_v13 = vsel %vm138_vm0, %v137_v10, 0.0  ;;  %v162_v14 = vrot.slane %v137_v10, 2 }
  0x14   : >> { %v150_v15 = vrot.slane %v137_v10, 1  ;;  %140 = vadd.xlane.f32.xlu0 %v139_v13  ;;  %231 = vst.msk [vmem:[%s453_s15] sm:$0xff] (%p122_p4), %vm230_vm9, %v514_v11  ;;  %232 = vst.msk [vmem:[%s453_s15 + $0x8] sm:$0xff] (%p122_p4), %vm230_vm9, %v515_v12 }
  0x15   : >> { %v164_v16 = vsel %vm138_vm0, %v162_v14, 0.0 }
  0x16   : >> { %v152_v17 = vsel %vm138_vm0, %v150_v15, 0.0  ;;  %165 = vadd.xlane.f32.xlu1 %v164_v16 }
  0x18   : >> { %153 = vadd.xlane.f32.xlu0 %v152_v17 }
  0x9d   : >> { %v141_v18 = vpop.xlane.xlu0 %140 }
  0x9e   : >> { %v142_v19 = vrot.slane %v141_v18, 4 }
  0x9f   : >> { %v166_v20 = vpop.xlane.xlu1 %165 }
  0xa0   : >> { %v143_v21 = vadd.f32 %v142_v19, %v141_v18  ;;  %v167_v22 = vrot.slane %v166_v20, 4 }
  0xa1   : >> { %v154_v23 = vpop.xlane.xlu0 %153 }
  0xa2   : >> { %v144_v24 = vrot.slane %v143_v21, 2  ;;  %v168_v25 = vadd.f32 %v167_v22, %v166_v20  ;;  %v155_v26 = vrot.slane %v154_v23, 4 }
  0xa4   : >> { %v169_v27 = vrot.slane %v168_v25, 2  ;;  %v156_v28 = vadd.f32 %v155_v26, %v154_v23  ;;  %v145_v29 = vadd.f32 %v144_v24, %v143_v21 }
  0xa6   : >> { %v157_v30 = vrot.slane %v156_v28, 2  ;;  %v146_v31 = vrot.slane %v145_v29, 1  ;;  %v170_v32 = vadd.f32 %v169_v27, %v168_v25 }
  0xa8   : >> { %v147_v33 = vadd.f32 %v146_v31, %v145_v29  ;;  %v158_v34 = vadd.f32 %v157_v30, %v156_v28  ;;  %v171_v35 = vrot.slane %v170_v32, 1 }
  0xaa   : >> { %316 = vpush %v147_v33  ;;  %v159_v36 = vrot.slane %v158_v34, 1  ;;  %v172_v38 = vadd.f32 %v171_v35, %v170_v32 }
  0xac   : >> { %v160_v37 = vadd.f32 %v159_v36, %v158_v34 }
  0xae   : >> { %318 = vpush %v160_v37 }
  0xaf   : >> { %320 = vpush %v172_v38 }
  0xdb   : >> { %s317_s18 = spop %316 }
  0xdc   : >> { %v174_v39 = vstv %s317_s18 }
  0xdd   : >> { %v175_v41 = vsub.f32 %v455_v4, %v174_v39 }
  0xdf   : >> { %s319_s19 = spop %318  ;;  %v180_v47 = vmul.f32 %v175_v41, %v175_v41 }
  0xe0   : >> { %v176_v40 = vstv %s319_s19  ;;  %s321_s20 = spop %320 }
  0xe1   : >> { %v177_v42 = vsub.f32 %v455_v4, %v176_v40  ;;  %v178_v43 = vstv %s321_s20 }
  0xe2   : >> { %v179_v44 = vsub.f32 %v455_v4, %v178_v43 }
  0xe3   : >> { %v181_v45 = vmul.f32 %v177_v42, %v177_v42 }
  0xe4   : >> { %v186_v46 = vmul.f32 %v179_v44, %v179_v44 }
  0xe5   : >> { %v183_v48 = vrot.slane %v181_v45, 1 }
  0xe6   : >> { %v188_v50 = vrot.slane %v186_v46, 2 }
  0xe7   : >> { %v185_v49 = vadd.f32 %v183_v48, %v180_v47 }
  0xe9   : >> { %v190_v51 = vadd.f32 %v188_v50, %v185_v49 }
  0xeb   : >> { %v191_v7 = vmin.f32 %v412_v7, %v190_v51  }
  0xed   : >> { %v192_v52 = vsel %vm138_vm0, %v191_v7, -inf }
  0xee   : >> { %193 = vmax.xlane.f32.xlu1 %v192_v52 }
 0x177   : >> { %v194_v53 = vpop.xlane.xlu1 %193 }
 0x178   : >> { %v195_v54 = vrot.slane %v194_v53, 4 }
 0x17a   : >> { %v196_v55 = vmax.f32 %v194_v53, %v195_v54 }
 0x17c   : >> { %v197_v56 = vrot.slane %v196_v55, 2 }
 0x17e   : >> { %v198_v57 = vmax.f32 %v196_v55, %v197_v56 }
 0x180   : >> { %v199_v58 = vrot.slane %v198_v57, 1 }
 0x182   : >> { %v200_v59 = vmax.f32 %v198_v57, %v199_v58 }
 0x184   : >> { %322 = vpush %v200_v59 }
 0x1b5   : >> { %s323_s21 = spop %322 }
 0x1b6   : >> { %v202_v60 = vstv %s323_s21 }
 0x1b7   : >> { %vm203_vm4 = vcmp.eq.f32.partialorder %v191_v7, %v202_v60 }
 0x1b8   : >> { %v204_v61 = vsel %vm203_vm4, %v440_v1, 64 }
 0x1b9   : >> { %v205_v62 = vsel %vm138_vm0, %v204_v61, 2147483647 }
 0x1ba   : >> { %v207_v63 = vshra.s32 %v205_v62, 16  ;;  %v206_v5 = vand.u32 65535, %v205_v62 }
 0x1bc   : >> { %v209_v0 = vcvt.s32.f32 %v207_v63  ;;  %v208_v8 = vcvt.s32.f32 %v206_v5  ;;  %v516_v5 = vmov %v515_v12 }
 0x1be   : >> { %210 = vmin.xlane.f32.xlu0 %v209_v0 }
 0x247   : >> { %v211_v6 = vpop.xlane.xlu0 %210 }
 0x248   : >> { %vm212_vm5 = vcmp.eq.f32.partialorder %v209_v0, %v211_v6  ;;  %v217_v10 = vcvt.f32.s32 %v211_v6  ;;  %v517_v6 = vmov %v514_v11 }
 0x249   : >> { %v213_v9 = vsel %vm212_vm5, %v208_v8, inf }
 0x24a   : >> { %214 = vmin.xlane.f32.xlu1 %v213_v9  ;;  %v218_v14 = vshll.u32 %v217_v10, 16 }
 0x2d3   : >> { %v215_v13 = vpop.xlane.xlu1 %214 }
 0x2d4   : >> { %v216_v15 = vcvt.f32.s32 %v215_v13 }
 0x2d6   : >> { %v219_v16 = vadd.s32 %v218_v14, %v216_v15 }
 0x2d8   : >> { %v220_v17 = vrot.slane %v219_v16, 4 }
 0x2da   : >> { %vm221_vm6 = vcmp.lt.s32.totalorder %v219_v16, %v220_v17 }
 0x2db   : >> { %v222_v18 = vsel %vm221_vm6, %v219_v16, %v220_v17 }
 0x2dc   : >> { %v223_v19 = vrot.slane %v222_v18, 2 }
 0x2de   : >> { %vm224_vm7 = vcmp.lt.s32.totalorder %v222_v18, %v223_v19 }
 0x2df   : >> { %v225_v20 = vsel %vm224_vm7, %v222_v18, %v223_v19 }
 0x2e0   : >> { %v226_v21 = vrot.slane %v225_v20, 1 }
 0x2e2   : >> { %vm227_vm8 = vcmp.lt.s32.totalorder %v225_v20, %v226_v21 }
 0x2e3   : >> { %v228_v22 = vsel %vm227_vm8, %v225_v20, %v226_v21 }
 0x2e4   : >> { %324 = vpush %v228_v22 }
 0x311   : > { %124 = sbr.rel (!%p122_p4) target bundleno = 16 (0x10), region = 61 }
 0x315   : >> { %s325_s16 = spop %324  }
 0x316 PF: > { %s11_s6 = sadd.s32 1, %s400_s6  }
 0x317   : > { %p8_p5 = scmp.ge.s32.totalorder %s11_s6, 4  }
 0x319   :  { %10 = sbr.rel (!%p8_p5) target bundleno = 1 (0x1), region = 72 }

// kernel: _lambda_.3
= control target key start
LH: loop header
LB: loop body
LE: loop exit
PB: predicated region body
PF: predicated region fallthrough
CT: control target
= control target key end

     0   :  { %9 = vsyncpa [#allocation3], 0  ;;  %s5274_s0 = inlined_call_operand.vmem [shape: f32[2,16,3], index: 0, kind: input, shape index: {}]   ;;  %s5275_s1 = inlined_call_operand.vmem [shape: f32[2,3,64], index: 1, kind: input, shape index: {}]   ;;  %s5276_s2 = inlined_call_operand.vmem [shape: f32[2,64,16], index: 2, kind: input, shape index: {}]   ;;  %s5277_s3 = inlined_call_operand.vmem [shape: f32[2,16,16], index: 3, kind: input, shape index: {}]   ;;  %s5278_s4 = inlined_call_operand.hbm [shape: f32[2,16,8,32], index: 4, kind: output, shape index: {}]  }
   0x1   :  { %11 = vsyncpa [#allocation3 + $0x1], 0  ;;  %s3880_s15 = smov 0   ;;  %s3882_s16 = smov 0  }
   0x2   :  { %s3884_s17 = smov 0   ;;  %s3886_s18 = smov 0  }
   0x3   :  { %s3888_s19 = smov 0   ;;  %s3890_s20 = smov 0  }
   0x4 LB: > { %s3411_s21 = sadd.s32 4294967295, %s3844_s20   ;;  %s3412_s22 = sadd.s32 4294967294, %s3844_s20   ;;  %s3844_s20 = sphi %s3890_s20, %s17_s20   ;;  %s3840_s19 = sphi %s3888_s19, %s5293_s19   ;;  %s3836_s18 = sphi %s3886_s18, %s5292_s18   ;;  %s3832_s17 = sphi %s3884_s17, %s5291_s17   ;;  %s3828_s16 = sphi %s3882_s16, %s5290_s16   ;;  %s3824_s15 = sphi %s3880_s15, %s5289_s15  }
   0x5   : > { %s29_s23 = sadd.s32 1, %s3840_s19  ;;  %s146_s24 = sadd.s32 1, %s3832_s17 }
   0x6   : > { %p31_p0 = scmp.ge.s32.totalorder %s29_s23, 2  ;;  %p156_p1 = scmp.ne.s32.totalorder %s3832_s17, %s3828_s16 }
   0x7   : > { %p157_p2 = scmp.eq.s32.totalorder %s3411_s21, 1  ;;  %p162_p3 = scmp.ne.s32.totalorder %s3828_s16, %s3824_s15 }
   0x8   : > { %s5295_s23 = smov (%p31_p0, %s29_s23), 0  ;;  %p163_p5 = scmp.eq.s32.totalorder %s3412_s22, 1 }
   0x9   : > { %p3920_p4 = por %p157_p2, %p156_p1  ;;  %s141_s26 = ssub.s32 %s3840_s19, %s5295_s23 }
   0xa   : > { %p3415_p6 = scmp.ge.s32.totalorder %s3844_s20, 1  ;;  %p144_p7 = scmp.eq.s32.totalorder %s141_s26, 0 }
   0xb   : > { %p3927_p8 = por %p163_p5, %p162_p3  ;;  %p222_p9 = scmp.lt.s32.totalorder %s3844_s20, 3 }
   0xc   : > { %s3933_s28 = scalar_select %p144_p7, %s3832_s17, %s146_s24  }
   0xd   : > { %p223_p10 = pnand %p3415_p6, %p222_p9 }
   0xf   : > { %226 = sbr.rel (%p223_p10) target bundleno = 3847 (0xf07), region = 36 }
  0x14   : > { %p271_p11 = scmp.lt.s32.totalorder %s3836_s18, 1  ;;  %v3846_v0 = vmov 0   ;;  %v3847_v6 = vmov 1   ;;  %v3848_v9 = vmov 2   ;;  %v323_v13 = vlaneseq  ;;  %s3464_s7 = sshll.u32 %s3836_s18, 11 }
  0x15   : > { %3762 = vset.pattern.permute.xlu1 %v3846_v0  ;;  %3760 = vset.pattern.permute.xlu0 %v3846_v0  ;;  %vm373_vm0 = vcmask 523264   ;;  %s3852_s13 = smov [#allocation2]  }
  0x16   : > { %s3937_s29 = scalar_select %p271_p11, %s3836_s18, 1  ;;  %v4010_v14 = vshrl.u32 %v323_v13, 7  ;;  %v4023_v46 = vand.u32 127, %v323_v13 }
  0x17   : > { %s3772_s14 = sshll.u32 %s3852_s13, 4  ;;  %s3773_s14 = int_to_ptr.vmem [resolvable:$false] %s3772_s14 }
  0x18   : > { %s3461_s30 = sshll.u32 %s3937_s29, 4  ;;  %s3462_s5 = sshll.u32 %s3937_s29, 6  ;;  %v4016_v15 = vsub.s32 0, %v4010_v14  ;;  %v343_v18 = vsub.s32 1, %v4010_v14  ;;  %v361_v21 = vsub.s32 2, %v4010_v14 }
  0x19   : > { %s278_s8 = scalar_lea.vmem %s5274_s0, %s3461_s30  ;;  %s3949_s11 = scalar_lea.vmem %s5276_s2, %s3462_s5 }
  0x1a   : > { %v301_v1 = vld [vmem:[%s278_s8 + $0x8] sm:$0xff]  ;;  %v3952_v2 = vld [vmem:[%s3949_s11 + $0x38] sm:$0xff]  ;;  %v3955_v3 = vld [vmem:[%s3949_s11 + $0x30] sm:$0xff]  ;;  %s3419_s12 = sshll.u32 %s3937_s29, 2  ;;  %s297_s26 = scalar_lea.vmem %s5277_s3, %s3461_s30 }
  0x1b   : > { %320 = vperm.xlu1 %3762, %v301_v1   ;;  %v300_v4 = vld [vmem:[%s278_s8] sm:$0xff]  ;;  %3545 = vmatprep.subr.mxu0 %v3952_v2  ;;  %v3960_v5 = vld [vmem:[%s3949_s11 + $0x28] sm:$0xff]  ;;  %v3971_v8 = vld [vmem:[%s3949_s11 + $0x18] sm:$0xff]  ;;  %s283_s21 = scalar_lea.vmem %s5275_s1, %s3419_s12  ;;  %s3851_s29 = smov 16  }
  0x1c   : > { %3564 = vmatprep.subr.mxu1 %v3952_v2  ;;  %315 = vperm.xlu0 %3760, %v300_v4   ;;  %v3965_v7 = vld [vmem:[%s3949_s11 + $0x20] sm:$0xff]  ;;  %v3976_v10 = vld [vmem:[%s3949_s11 + $0x10] sm:$0xff]  ;;  %v3982_v11 = vld [vmem:[%s3949_s11 + $0x8] sm:$0xff]  ;;  %s267_s30 = sand.u32 1, %s3828_s16  }
  0x1d   : > { %3546 = vmatpush3.msra.mxu0 %v3952_v2  ;;  %3565 = vmatpush3.msra.mxu1 %v3952_v2  ;;  %v3987_v12 = vld [vmem:[%s3949_s11] sm:$0xff]  ;;  %s3416_s5 = sshll.u32 %s267_s30, 7  ;;  %s5193_s11 = scalar_lea.hbm %s5278_s4, %s3464_s7 }
  0x1e   : > { %3547 = vmatprep.subr.mxu0 %v3955_v3  ;;  %3566 = vmatprep.subr.mxu1 %v3955_v3  ;;  %v302_v16 = vld [vmem:[%s283_s21] sm:$0x7]  ;;  %s5077_s6 = scalar_lea.vmem [#allocation2], %s3416_s5  ;;  %s5229_s18 = scalar_lea.sflag [#allocation3], %s267_s30 }
  0x1f   : > { %3763 = vset.pattern.permute.xlu1 %v3847_v6  ;;  %3548 = vmatpush3.msra.mxu0 %v3955_v3  ;;  %v326_v19 = vrot.slane %v302_v16, %v4016_v15  ;;  %v344_v22 = vrot.slane %v302_v16, %v343_v18  ;;  %v362_v25 = vrot.slane %v302_v16, %v361_v21  ;;  %v3849_v21 = vmov 0.0   ;;  %s3290_s8 = sshll.u32 %s5077_s6, 4  ;;  %s3774_s21 = scalar_lea.vmem %s3773_s14, 4096  ;;  %s5197_s8 = int_to_ptr.vmem [resolvable:$true] %s3290_s8 }
  0x20   : > { %338 = vperm.xlu1 %3763, %v301_v1   ;;  %3761 = vset.pattern.permute.xlu0 %v3847_v6  ;;  %s3768_s12 = scalar_lea.vmem %s5197_s8, 2048  ;;  %p3775_p1 = scmp.lt.s32.totalorder %s5197_s8, %s3773_s14 }
  0x21   : > { %3549 = vmatprep.subr.mxu0 %v3960_v5  ;;  %334 = vperm.xlu0 %3761, %v300_v4   ;;  %p3769_p12 = scmp.ne.s32.totalorder %s5197_s8, %s3768_s12  ;;  %p3776_p2 = scmp.lt.s32.totalorder %s3774_s21, %s3768_s12 }
  0x22   : > { %3550 = vmatpush3.msra.mxu0 %v3960_v5  ;;  %3567 = vmatpush3.msra.mxu1 %v3955_v3 }
  0x23   : > { %3551 = vmatprep.subr.mxu0 %v3965_v7  ;;  %3568 = vmatprep.subr.mxu1 %v3960_v5  ;;  %p3770_p13 = pnand %p3769_p12, %p3920_p4  ;;  %p3777_p3 = por %p3776_p2, %p3775_p1 }
  0x24   : > { %3764 = vset.pattern.permute.xlu1 %v3848_v9  ;;  %3552 = vmatpush3.msra.mxu0 %v3965_v7 }
  0x25   : > { %352 = vperm.xlu1 %3764, %v300_v4   ;;  %3553 = vmatprep.subr.mxu0 %v3971_v8  ;;  %p3771_p0 = pneg %p3770_p13 }
  0x26   : > { %3765 = vset.pattern.permute.xlu0 %v3848_v9  ;;  %3554 = vmatpush3.msra.mxu0 %v3971_v8 }
  0x27   : > { %356 = vperm.xlu0 %3765, %v301_v1   ;;  %3555 = vmatprep.subr.mxu0 %v3976_v10  ;;  %p3778_p5 = pnand %p3777_p3, %p3771_p0 }
  0x28   : > { %3556 = vmatpush3.msra.mxu0 %v3976_v10  ;;  %3569 = vmatpush3.msra.mxu1 %v3960_v5 }
  0x29   : > { %3557 = vmatprep.subr.mxu0 %v3982_v11  ;;  %3570 = vmatprep.subr.mxu1 %v3965_v7 }
  0x2a   : > { %3558 = vmatpush3.msra.mxu0 %v3982_v11  ;;  %3571 = vmatpush3.msra.mxu1 %v3965_v7 }
  0x2b   : > { %3559 = vmatprep.subr.mxu0 %v3987_v12  ;;  %3572 = vmatprep.subr.mxu1 %v3971_v8 }
  0x2c   : > { %3560 = vmatpush3.msra.mxu0 %v3987_v12  ;;  %3573 = vmatpush3.msra.mxu1 %v3971_v8 }
  0x2d   : > { %3583 = vmatprep.subr.mxu0 %v3952_v2  ;;  %3574 = vmatprep.subr.mxu1 %v3976_v10 }
  0x2e   : > { %3575 = vmatpush3.msra.mxu1 %v3976_v10 }
  0x2f   : > { %3576 = vmatprep.subr.mxu1 %v3982_v11 }
  0x30   : > { %3577 = vmatpush3.msra.mxu1 %v3982_v11 }
  0x31   : > { %3578 = vmatprep.subr.mxu1 %v3987_v12 }
  0x32   : > { %3579 = vmatpush3.msra.mxu1 %v3987_v12 }
  0x33   : > { %3602 = vmatprep.subr.mxu1 %v3952_v2 }
  0x96   : > { %v321_v17 = vpop.permute.xlu1 %320 }
  0x97   : > { %v316_v20 = vpop.permute.xlu0 %315  ;;  %v328_v29 = vsub.f32 %v321_v17, %v326_v19 }
  0x98   : > { %v327_v24 = vsub.f32 %v316_v20, %v326_v19 }
  0x99   : > { %v330_v38 = vmul.f32 %v328_v29, %v328_v29 }
  0x9a   : > { %v329_v31 = vmul.f32 %v327_v24, %v327_v24 }
  0x9b   : > { %v339_v23 = vpop.permute.xlu1 %338 }
  0x9c   : > { %v346_v26 = vsub.f32 %v339_v23, %v344_v22  ;;  %v335_v27 = vpop.permute.xlu0 %334 }
  0x9d   : > { %v345_v28 = vsub.f32 %v335_v27, %v344_v22 }
  0x9e   : > { %v348_v34 = vmul.f32 %v346_v26, %v346_v26 }
  0x9f   : > { %v347_v32 = vmul.f32 %v345_v28, %v345_v28 }
  0xa0   : > { %v353_v30 = vpop.permute.xlu1 %352  ;;  %v350_v41 = vadd.f32 %v348_v34, %v330_v38 }
  0xa1   : > { %v363_v33 = vsub.f32 %v353_v30, %v362_v25  ;;  %v349_v35 = vadd.f32 %v347_v32, %v329_v31 }
  0xa2   : > { %v357_v37 = vpop.permute.xlu0 %356 }
  0xa3   : > { %v365_v36 = vmul.f32 %v363_v33, %v363_v33  ;;  %v364_v39 = vsub.f32 %v357_v37, %v362_v25 }
  0xa5   : > { %v367_v40 = vadd.f32 %v365_v36, %v349_v35  ;;  %v366_v42 = vmul.f32 %v364_v39, %v364_v39 }
  0xa7   : > { %v374_v43 = vsel %vm373_vm0, %v367_v40, inf  ;;  %v368_v44 = vadd.f32 %v366_v42, %v350_v41 }
  0xa8   : > { %375 = vmin.xlane.f32.xlu1 %v374_v43 }
  0xa9   : > { %v377_v45 = vsel %vm373_vm0, %v368_v44, inf }
  0xaa   : > { %378 = vmin.xlane.f32.xlu0 %v377_v45 }
 0x131   : > { %v376_v47 = vpop.xlane.xlu1 %375 }
 0x132   : > { %vm380_vm1 = vcmp.eq.f32.partialorder %v367_v40, %v376_v47 }
 0x133   : > { %v382_v48 = vsel %vm380_vm1, %v4023_v46, 64  ;;  %v379_v50 = vpop.xlane.xlu0 %378 }
 0x134   : > { %v384_v49 = vsel %vm373_vm0, %v382_v48, 2147483647  ;;  %vm381_vm2 = vcmp.eq.f32.partialorder %v368_v44, %v379_v50 }
 0x135   : > { %v386_v51 = vshra.s32 %v384_v49, 16  ;;  %v383_v52 = vsel %vm381_vm2, %v4023_v46, 64  ;;  %v385_v57 = vand.u32 65535, %v384_v49 }
 0x136   : > { %v399_v53 = vsel %vm373_vm0, %v383_v52, 2147483647 }
 0x137   : > { %v388_v54 = vcvt.s32.f32 %v386_v51  ;;  %v401_v55 = vshra.s32 %v399_v53, 16  ;;  %v400_v58 = vand.u32 65535, %v399_v53  ;;  %v387_v60 = vcvt.s32.f32 %v385_v57 }
 0x139   : > { %389 = vmin.xlane.f32.xlu1 %v388_v54  ;;  %v403_v56 = vcvt.s32.f32 %v401_v55  ;;  %v402_v63 = vcvt.s32.f32 %v400_v58 }
 0x13b   : > { %404 = vmin.xlane.f32.xlu0 %v403_v56 }
 0x1c2   : > { %v390_v59 = vpop.xlane.xlu1 %389 }
 0x1c3   : > { %vm391_vm3 = vcmp.eq.f32.partialorder %v388_v54, %v390_v59  ;;  %v396_v1 = vcvt.f32.s32 %v390_v59 }
 0x1c4   : > { %v392_v61 = vsel %vm391_vm3, %v387_v60, inf  ;;  %v405_v62 = vpop.xlane.xlu0 %404 }
 0x1c5   : > { %393 = vmin.xlane.f32.xlu1 %v392_v61  ;;  %vm406_vm4 = vcmp.eq.f32.partialorder %v403_v56, %v405_v62  ;;  %v411_v4 = vcvt.f32.s32 %v405_v62  ;;  %v397_v9 = vshll.u32 %v396_v1, 16 }
 0x1c6   : > { %v407_v0 = vsel %vm406_vm4, %v402_v63, inf }
 0x1c7   : > { %408 = vmin.xlane.f32.xlu0 %v407_v0  ;;  %v412_v18 = vshll.u32 %v411_v4, 16 }
 0x24e   : > { %v394_v6 = vpop.xlane.xlu1 %393 }
 0x24f   : > { %v395_v13 = vcvt.f32.s32 %v394_v6 }
 0x250   : > { %v409_v17 = vpop.xlane.xlu0 %408 }
 0x251   : > { %v398_v16 = vadd.s32 %v397_v9, %v395_v13  ;;  %v410_v19 = vcvt.f32.s32 %v409_v17 }
 0x253   : > { %vm414_vm5 = vcmp.eq.s32.totalorder %v4023_v46, %v398_v16  ;;  %v413_v20 = vadd.s32 %v412_v18, %v410_v19 }
 0x254   : > { %v3424_v22 = vsel %vm414_vm5, 1.0, %v3849_v21  ;;  %v4031_v23 = vsel %vm414_vm5, inf, %v367_v40 }
 0x255   : > { %3561 = vmatprep.mubr.msk.f32.mxu0 %vm373_vm0, %v3424_v22  ;;  %v702_v24 = vsel %vm373_vm0, %v4031_v23, inf  ;;  %vm415_vm6 = vcmp.eq.s32.totalorder %v4023_v46, %v413_v20 }
 0x256   : > { %703 = vmin.xlane.f32.xlu1 %v702_v24  ;;  %v4037_v25 = vsel %vm415_vm6, inf, %v368_v44  ;;  %v3425_v26 = vsel %vm415_vm6, 1.0, %v3849_v21 }
 0x257   : > { %v705_v27 = vsel %vm373_vm0, %v4037_v25, inf  ;;  %3562 = vmatmul.mubr.msk.f32.vlgmr.msra.gmra.mxu0 %vm373_vm0, %v3425_v26 }
 0x258   : > { %706 = vmin.xlane.f32.xlu0 %v705_v27  ;;  %3584 = vmatpush3.msra.mxu0 %v3952_v2 }
 0x259   : > { %3585 = vmatprep.subr.mxu0 %v3955_v3 }
 0x25a   : > { %3586 = vmatpush3.msra.mxu0 %v3955_v3 }
 0x25b   : > { %3587 = vmatprep.subr.mxu0 %v3960_v5 }
 0x25c   : > { %3588 = vmatpush3.msra.mxu0 %v3960_v5 }
 0x25d   : > { %3589 = vmatprep.subr.mxu0 %v3965_v7 }
 0x25e   : > { %3590 = vmatpush3.msra.mxu0 %v3965_v7 }
 0x25f   : > { %3591 = vmatprep.subr.mxu0 %v3971_v8 }
 0x260   : > { %3592 = vmatpush3.msra.mxu0 %v3971_v8 }
 0x261   : > { %3593 = vmatprep.subr.mxu0 %v3976_v10 }
 0x262   : > { %3594 = vmatpush3.msra.mxu0 %v3976_v10 }
 0x263   : > { %3595 = vmatprep.subr.mxu0 %v3982_v11 }
 0x264   : > { %3596 = vmatpush3.msra.mxu0 %v3982_v11 }
 0x265   : > { %3597 = vmatprep.subr.mxu0 %v3987_v12 }
 0x266   : > { %3598 = vmatpush3.msra.mxu0 %v3987_v12 }
 0x267   : > { %3621 = vmatprep.subr.mxu0 %v3952_v2 }
 0x2df   : > { %v704_v28 = vpop.xlane.xlu1 %703 }
 0x2e0   : > { %vm708_vm7 = vcmp.eq.f32.partialorder %v4031_v23, %v704_v28 }
 0x2e1   : > { %v710_v29 = vsel %vm708_vm7, %v4023_v46, 64  ;;  %v707_v31 = vpop.xlane.xlu0 %706 }
 0x2e2   : > { %v712_v30 = vsel %vm373_vm0, %v710_v29, 2147483647  ;;  %vm709_vm8 = vcmp.eq.f32.partialorder %v4037_v25, %v707_v31 }
 0x2e3   : > { %v714_v32 = vshra.s32 %v712_v30, 16  ;;  %v711_v33 = vsel %vm709_vm8, %v4023_v46, 64  ;;  %v713_v38 = vand.u32 65535, %v712_v30 }
 0x2e4   : > { %v727_v34 = vsel %vm373_vm0, %v711_v33, 2147483647 }
 0x2e5   : > { %v716_v35 = vcvt.s32.f32 %v714_v32  ;;  %v729_v36 = vshra.s32 %v727_v34, 16  ;;  %v728_v39 = vand.u32 65535, %v727_v34  ;;  %v715_v41 = vcvt.s32.f32 %v713_v38 }
 0x2e7   : > { %717 = vmin.xlane.f32.xlu1 %v716_v35  ;;  %v731_v37 = vcvt.s32.f32 %v729_v36  ;;  %v730_v44 = vcvt.s32.f32 %v728_v39 }
 0x2e9   : > { %732 = vmin.xlane.f32.xlu0 %v731_v37 }
 0x370   : > { %v718_v40 = vpop.xlane.xlu1 %717 }
 0x371   : > { %vm719_vm9 = vcmp.eq.f32.partialorder %v716_v35, %v718_v40  ;;  %v724_v47 = vcvt.f32.s32 %v718_v40 }
 0x372   : > { %v720_v42 = vsel %vm719_vm9, %v715_v41, inf  ;;  %v733_v43 = vpop.xlane.xlu0 %732 }
 0x373   : > { %721 = vmin.xlane.f32.xlu1 %v720_v42  ;;  %vm734_vm10 = vcmp.eq.f32.partialorder %v731_v37, %v733_v43  ;;  %v739_v48 = vcvt.f32.s32 %v733_v43  ;;  %v725_v50 = vshll.u32 %v724_v47, 16 }
 0x374   : > { %v735_v45 = vsel %vm734_vm10, %v730_v44, inf }
 0x375   : > { %736 = vmin.xlane.f32.xlu0 %v735_v45  ;;  %v740_v54 = vshll.u32 %v739_v48, 16 }
 0x3fc   : > { %v722_v49 = vpop.xlane.xlu1 %721 }
 0x3fd   : > { %v723_v51 = vcvt.f32.s32 %v722_v49 }
 0x3fe   : > { %v737_v53 = vpop.xlane.xlu0 %736 }
 0x3ff   : > { %v726_v52 = vadd.s32 %v725_v50, %v723_v51  ;;  %v738_v55 = vcvt.f32.s32 %v737_v53 }
 0x401   : > { %vm742_vm11 = vcmp.eq.s32.totalorder %v4023_v46, %v726_v52  ;;  %v741_v56 = vadd.s32 %v740_v54, %v738_v55 }
 0x402   : > { %v3428_v57 = vsel %vm742_vm11, 1.0, %v3849_v21  ;;  %v4068_v58 = vsel %vm742_vm11, inf, %v4031_v23 }
 0x403   : > { %3580 = vmatprep.mubr.msk.f32.mxu1 %vm373_vm0, %v3428_v57  ;;  %v1030_v59 = vsel %vm373_vm0, %v4068_v58, inf  ;;  %vm743_vm12 = vcmp.eq.s32.totalorder %v4023_v46, %v741_v56 }
 0x404   : > { %1031 = vmin.xlane.f32.xlu1 %v1030_v59  ;;  %v4075_v60 = vsel %vm743_vm12, inf, %v4037_v25  ;;  %v3429_v61 = vsel %vm743_vm12, 1.0, %v3849_v21 }
 0x405   : > { %v1033_v62 = vsel %vm373_vm0, %v4075_v60, inf  ;;  %3581 = vmatmul.mubr.msk.f32.vlgmr.msra.gmra.mxu1 %vm373_vm0, %v3429_v61 }
 0x406   : > { %1034 = vmin.xlane.f32.xlu0 %v1033_v62  ;;  %3603 = vmatpush3.msra.mxu1 %v3952_v2 }
 0x407   : > { %3604 = vmatprep.subr.mxu1 %v3955_v3 }
 0x408   : > { %3605 = vmatpush3.msra.mxu1 %v3955_v3 }
 0x409   : > { %3606 = vmatprep.subr.mxu1 %v3960_v5 }
 0x40a   : > { %3607 = vmatpush3.msra.mxu1 %v3960_v5 }
 0x40b   : > { %3608 = vmatprep.subr.mxu1 %v3965_v7 }
 0x40c   : > { %3609 = vmatpush3.msra.mxu1 %v3965_v7 }
 0x40d   : > { %3610 = vmatprep.subr.mxu1 %v3971_v8 }
 0x40e   : > { %3611 = vmatpush3.msra.mxu1 %v3971_v8 }
 0x40f   : > { %3612 = vmatprep.subr.mxu1 %v3976_v10 }
 0x410   : > { %3613 = vmatpush3.msra.mxu1 %v3976_v10 }
 0x411   : > { %3614 = vmatprep.subr.mxu1 %v3982_v11 }
 0x412   : > { %3615 = vmatpush3.msra.mxu1 %v3982_v11 }
 0x413   : > { %3616 = vmatprep.subr.mxu1 %v3987_v12 }
 0x414   : > { %3617 = vmatpush3.msra.mxu1 %v3987_v12 }
 0x415   : > { %3640 = vmatprep.subr.mxu1 %v3952_v2 }
 0x48d   : > { %v1032_v63 = vpop.xlane.xlu1 %1031 }
 0x48e   : > { %vm1036_vm13 = vcmp.eq.f32.partialorder %v4068_v58, %v1032_v63 }
 0x48f   : > { %v1038_v0 = vsel %vm1036_vm13, %v4023_v46, 64  ;;  %v1035_v4 = vpop.xlane.xlu0 %1034 }
 0x490   : > { %v1040_v1 = vsel %vm373_vm0, %v1038_v0, 2147483647  ;;  %vm1037_vm14 = vcmp.eq.f32.partialorder %v4075_v60, %v1035_v4 }
 0x491   : > { %v1042_v6 = vshra.s32 %v1040_v1, 16  ;;  %v1039_v9 = vsel %vm1037_vm14, %v4023_v46, 64  ;;  %v1041_v19 = vand.u32 65535, %v1040_v1 }
 0x492   : > { %v1055_v13 = vsel %vm373_vm0, %v1039_v9, 2147483647 }
 0x493   : > { %v1044_v16 = vcvt.s32.f32 %v1042_v6  ;;  %v1057_v17 = vshra.s32 %v1055_v13, 16  ;;  %v1056_v20 = vand.u32 65535, %v1055_v13  ;;  %v1043_v23 = vcvt.s32.f32 %v1041_v19 }
 0x495   : > { %1045 = vmin.xlane.f32.xlu1 %v1044_v16  ;;  %v1059_v18 = vcvt.s32.f32 %v1057_v17  ;;  %v1058_v26 = vcvt.s32.f32 %v1056_v20 }
 0x497   : > { %1060 = vmin.xlane.f32.xlu0 %v1059_v18 }
 0x51e   : > { %v1046_v22 = vpop.xlane.xlu1 %1045 }
 0x51f   : > { %vm1047_vm15 = vcmp.eq.f32.partialorder %v1044_v16, %v1046_v22  ;;  %v1052_v28 = vcvt.f32.s32 %v1046_v22 }
 0x520   : > { %v1048_v24 = vsel %vm1047_vm15, %v1043_v23, inf  ;;  %v1061_v25 = vpop.xlane.xlu0 %1060 }
 0x521   : > { %1049 = vmin.xlane.f32.xlu1 %v1048_v24  ;;  %vm1062_vm1 = vcmp.eq.f32.partialorder %v1059_v18, %v1061_v25  ;;  %v1067_v29 = vcvt.f32.s32 %v1061_v25  ;;  %v1053_v31 = vshll.u32 %v1052_v28, 16 }
 0x522   : > { %v1063_v27 = vsel %vm1062_vm1, %v1058_v26, inf }
 0x523   : > { %1064 = vmin.xlane.f32.xlu0 %v1063_v27  ;;  %v1068_v35 = vshll.u32 %v1067_v29, 16 }
 0x5aa   : > { %v1050_v30 = vpop.xlane.xlu1 %1049 }
 0x5ab   : > { %v1051_v32 = vcvt.f32.s32 %v1050_v30 }
 0x5ac   : > { %v1065_v34 = vpop.xlane.xlu0 %1064 }
 0x5ad   : > { %v1054_v33 = vadd.s32 %v1053_v31, %v1051_v32  ;;  %v1066_v36 = vcvt.f32.s32 %v1065_v34 }
 0x5af   : > { %vm1070_vm2 = vcmp.eq.s32.totalorder %v4023_v46, %v1054_v33  ;;  %v1069_v37 = vadd.s32 %v1068_v35, %v1066_v36 }
 0x5b0   : > { %v3432_v38 = vsel %vm1070_vm2, 1.0, %v3849_v21  ;;  %v4106_v39 = vsel %vm1070_vm2, inf, %v4068_v58 }
 0x5b1   : > { %3599 = vmatprep.mubr.msk.f32.mxu0 %vm373_vm0, %v3432_v38  ;;  %v1358_v40 = vsel %vm373_vm0, %v4106_v39, inf  ;;  %vm1071_vm3 = vcmp.eq.s32.totalorder %v4023_v46, %v1069_v37 }
 0x5b2   : > { %1359 = vmin.xlane.f32.xlu1 %v1358_v40  ;;  %v4113_v41 = vsel %vm1071_vm3, inf, %v4075_v60  ;;  %v3433_v42 = vsel %vm1071_vm3, 1.0, %v3849_v21 }
 0x5b3   : > { %v1361_v43 = vsel %vm373_vm0, %v4113_v41, inf  ;;  %3600 = vmatmul.mubr.msk.f32.vlgmr.msra.gmra.mxu0 %vm373_vm0, %v3433_v42 }
 0x5b4   : > { %1362 = vmin.xlane.f32.xlu0 %v1361_v43  ;;  %3622 = vmatpush3.msra.mxu0 %v3952_v2 }
 0x5b5   : > { %3623 = vmatprep.subr.mxu0 %v3955_v3 }
 0x5b6   : > { %3624 = vmatpush3.msra.mxu0 %v3955_v3 }
 0x5b7   : > { %3625 = vmatprep.subr.mxu0 %v3960_v5 }
 0x5b8   : > { %3626 = vmatpush3.msra.mxu0 %v3960_v5 }
 0x5b9   : > { %3627 = vmatprep.subr.mxu0 %v3965_v7 }
 0x5ba   : > { %3628 = vmatpush3.msra.mxu0 %v3965_v7 }
 0x5bb   : > { %3629 = vmatprep.subr.mxu0 %v3971_v8 }
 0x5bc   : > { %3630 = vmatpush3.msra.mxu0 %v3971_v8 }
 0x5bd   : > { %3631 = vmatprep.subr.mxu0 %v3976_v10 }
 0x5be   : > { %3632 = vmatpush3.msra.mxu0 %v3976_v10 }
 0x5bf   : > { %3633 = vmatprep.subr.mxu0 %v3982_v11 }
 0x5c0   : > { %3634 = vmatpush3.msra.mxu0 %v3982_v11 }
 0x5c1   : > { %3635 = vmatprep.subr.mxu0 %v3987_v12 }
 0x5c2   : > { %3636 = vmatpush3.msra.mxu0 %v3987_v12 }
 0x5c3   : > { %3659 = vmatprep.subr.mxu0 %v3952_v2 }
 0x63b   : > { %v1360_v44 = vpop.xlane.xlu1 %1359 }
 0x63c   : > { %vm1364_vm4 = vcmp.eq.f32.partialorder %v4106_v39, %v1360_v44 }
 0x63d   : > { %v1366_v45 = vsel %vm1364_vm4, %v4023_v46, 64  ;;  %v1363_v48 = vpop.xlane.xlu0 %1362 }
 0x63e   : > { %v1368_v47 = vsel %vm373_vm0, %v1366_v45, 2147483647  ;;  %vm1365_vm5 = vcmp.eq.f32.partialorder %v4113_v41, %v1363_v48 }
 0x63f   : > { %v1370_v49 = vshra.s32 %v1368_v47, 16  ;;  %v1367_v50 = vsel %vm1365_vm5, %v4023_v46, 64  ;;  %v1369_v55 = vand.u32 65535, %v1368_v47 }
 0x640   : > { %v1383_v51 = vsel %vm373_vm0, %v1367_v50, 2147483647 }
 0x641   : > { %v1372_v52 = vcvt.s32.f32 %v1370_v49  ;;  %v1385_v53 = vshra.s32 %v1383_v51, 16  ;;  %v1384_v56 = vand.u32 65535, %v1383_v51  ;;  %v1371_v58 = vcvt.s32.f32 %v1369_v55 }
 0x643   : > { %1373 = vmin.xlane.f32.xlu1 %v1372_v52  ;;  %v1387_v54 = vcvt.s32.f32 %v1385_v53  ;;  %v1386_v61 = vcvt.s32.f32 %v1384_v56 }
 0x645   : > { %1388 = vmin.xlane.f32.xlu0 %v1387_v54 }
 0x6cc   : > { %v1374_v57 = vpop.xlane.xlu1 %1373 }
 0x6cd   : > { %vm1375_vm6 = vcmp.eq.f32.partialorder %v1372_v52, %v1374_v57  ;;  %v1380_v63 = vcvt.f32.s32 %v1374_v57 }
 0x6ce   : > { %v1376_v59 = vsel %vm1375_vm6, %v1371_v58, inf  ;;  %v1389_v60 = vpop.xlane.xlu0 %1388 }
 0x6cf   : > { %1377 = vmin.xlane.f32.xlu1 %v1376_v59  ;;  %vm1390_vm7 = vcmp.eq.f32.partialorder %v1387_v54, %v1389_v60  ;;  %v1395_v0 = vcvt.f32.s32 %v1389_v60  ;;  %v1381_v4 = vshll.u32 %v1380_v63, 16 }
 0x6d0   : > { %v1391_v62 = vsel %vm1390_vm7, %v1386_v61, inf }
 0x6d1   : > { %1392 = vmin.xlane.f32.xlu0 %v1391_v62  ;;  %v1396_v16 = vshll.u32 %v1395_v0, 16 }
 0x758   : > { %v1378_v1 = vpop.xlane.xlu1 %1377 }
 0x759   : > { %v1379_v6 = vcvt.f32.s32 %v1378_v1 }
 0x75a   : > { %v1393_v13 = vpop.xlane.xlu0 %1392 }
 0x75b   : > { %v1382_v9 = vadd.s32 %v1381_v4, %v1379_v6  ;;  %v1394_v17 = vcvt.f32.s32 %v1393_v13 }
 0x75d   : > { %vm1398_vm8 = vcmp.eq.s32.totalorder %v4023_v46, %v1382_v9  ;;  %v1397_v18 = vadd.s32 %v1396_v16, %v1394_v17 }
 0x75e   : > { %v3436_v19 = vsel %vm1398_vm8, 1.0, %v3849_v21  ;;  %v4144_v20 = vsel %vm1398_vm8, inf, %v4106_v39 }
 0x75f   : > { %3618 = vmatprep.mubr.msk.f32.mxu1 %vm373_vm0, %v3436_v19  ;;  %v1686_v22 = vsel %vm373_vm0, %v4144_v20, inf  ;;  %vm1399_vm9 = vcmp.eq.s32.totalorder %v4023_v46, %v1397_v18 }
 0x760   : > { %1687 = vmin.xlane.f32.xlu1 %v1686_v22  ;;  %v4151_v23 = vsel %vm1399_vm9, inf, %v4113_v41  ;;  %v3437_v24 = vsel %vm1399_vm9, 1.0, %v3849_v21 }
 0x761   : > { %v1689_v25 = vsel %vm373_vm0, %v4151_v23, inf  ;;  %3619 = vmatmul.mubr.msk.f32.vlgmr.msra.gmra.mxu1 %vm373_vm0, %v3437_v24 }
 0x762   : > { %1690 = vmin.xlane.f32.xlu0 %v1689_v25  ;;  %3641 = vmatpush3.msra.mxu1 %v3952_v2 }
 0x763   : > { %3642 = vmatprep.subr.mxu1 %v3955_v3 }
 0x764   : > { %3643 = vmatpush3.msra.mxu1 %v3955_v3 }
 0x765   : > { %3644 = vmatprep.subr.mxu1 %v3960_v5 }
 0x766   : > { %3645 = vmatpush3.msra.mxu1 %v3960_v5 }
 0x767   : > { %3646 = vmatprep.subr.mxu1 %v3965_v7 }
 0x768   : > { %3647 = vmatpush3.msra.mxu1 %v3965_v7 }
 0x769   : > { %3648 = vmatprep.subr.mxu1 %v3971_v8 }
 0x76a   : > { %3649 = vmatpush3.msra.mxu1 %v3971_v8 }
 0x76b   : > { %3650 = vmatprep.subr.mxu1 %v3976_v10 }
 0x76c   : > { %3651 = vmatpush3.msra.mxu1 %v3976_v10 }
 0x76d   : > { %3652 = vmatprep.subr.mxu1 %v3982_v11 }
 0x76e   : > { %3653 = vmatpush3.msra.mxu1 %v3982_v11 }
 0x76f   : > { %3654 = vmatprep.subr.mxu1 %v3987_v12 }
 0x770   : > { %3655 = vmatpush3.msra.mxu1 %v3987_v12 }
 0x771   : > { %3678 = vmatprep.subr.mxu1 %v3952_v2 }
 0x7e9   : > { %v1688_v26 = vpop.xlane.xlu1 %1687 }
 0x7ea   : > { %vm1692_vm10 = vcmp.eq.f32.partialorder %v4144_v20, %v1688_v26 }
 0x7eb   : > { %v1694_v27 = vsel %vm1692_vm10, %v4023_v46, 64  ;;  %v1691_v29 = vpop.xlane.xlu0 %1690 }
 0x7ec   : > { %v1696_v28 = vsel %vm373_vm0, %v1694_v27, 2147483647  ;;  %vm1693_vm11 = vcmp.eq.f32.partialorder %v4151_v23, %v1691_v29 }
 0x7ed   : > { %v1698_v30 = vshra.s32 %v1696_v28, 16  ;;  %v1695_v31 = vsel %vm1693_vm11, %v4023_v46, 64  ;;  %v1697_v36 = vand.u32 65535, %v1696_v28 }
 0x7ee   : > { %v1711_v32 = vsel %vm373_vm0, %v1695_v31, 2147483647 }
 0x7ef   : > { %v1700_v33 = vcvt.s32.f32 %v1698_v30  ;;  %v1713_v34 = vshra.s32 %v1711_v32, 16  ;;  %v1712_v37 = vand.u32 65535, %v1711_v32  ;;  %v1699_v39 = vcvt.s32.f32 %v1697_v36 }
 0x7f1   : > { %1701 = vmin.xlane.f32.xlu1 %v1700_v33  ;;  %v1715_v35 = vcvt.s32.f32 %v1713_v34  ;;  %v1714_v42 = vcvt.s32.f32 %v1712_v37 }
 0x7f3   : > { %1716 = vmin.xlane.f32.xlu0 %v1715_v35 }
 0x87a   : > { %v1702_v38 = vpop.xlane.xlu1 %1701 }
 0x87b   : > { %vm1703_vm12 = vcmp.eq.f32.partialorder %v1700_v33, %v1702_v38  ;;  %v1708_v44 = vcvt.f32.s32 %v1702_v38 }
 0x87c   : > { %v1704_v40 = vsel %vm1703_vm12, %v1699_v39, inf  ;;  %v1717_v41 = vpop.xlane.xlu0 %1716 }
 0x87d   : > { %1705 = vmin.xlane.f32.xlu1 %v1704_v40  ;;  %vm1718_vm13 = vcmp.eq.f32.partialorder %v1715_v35, %v1717_v41  ;;  %v1723_v45 = vcvt.f32.s32 %v1717_v41  ;;  %v1709_v48 = vshll.u32 %v1708_v44, 16 }
 0x87e   : > { %v1719_v43 = vsel %vm1718_vm13, %v1714_v42, inf }
 0x87f   : > { %1720 = vmin.xlane.f32.xlu0 %v1719_v43  ;;  %v1724_v52 = vshll.u32 %v1723_v45, 16 }
 0x906   : > { %v1706_v47 = vpop.xlane.xlu1 %1705 }
 0x907   : > { %v1707_v49 = vcvt.f32.s32 %v1706_v47 }
 0x908   : > { %v1721_v51 = vpop.xlane.xlu0 %1720 }
 0x909   : > { %v1710_v50 = vadd.s32 %v1709_v48, %v1707_v49  ;;  %v1722_v53 = vcvt.f32.s32 %v1721_v51 }
 0x90b   : > { %vm1726_vm14 = vcmp.eq.s32.totalorder %v4023_v46, %v1710_v50  ;;  %v1725_v54 = vadd.s32 %v1724_v52, %v1722_v53 }
 0x90c   : > { %v3440_v55 = vsel %vm1726_vm14, 1.0, %v3849_v21  ;;  %v4182_v56 = vsel %vm1726_vm14, inf, %v4144_v20 }
 0x90d   : > { %3637 = vmatprep.mubr.msk.f32.mxu0 %vm373_vm0, %v3440_v55  ;;  %v2014_v57 = vsel %vm373_vm0, %v4182_v56, inf  ;;  %vm1727_vm15 = vcmp.eq.s32.totalorder %v4023_v46, %v1725_v54 }
 0x90e   : > { %2015 = vmin.xlane.f32.xlu1 %v2014_v57  ;;  %v4189_v58 = vsel %vm1727_vm15, inf, %v4151_v23  ;;  %v3441_v59 = vsel %vm1727_vm15, 1.0, %v3849_v21 }
 0x90f   : > { %v2017_v60 = vsel %vm373_vm0, %v4189_v58, inf  ;;  %3638 = vmatmul.mubr.msk.f32.vlgmr.msra.gmra.mxu0 %vm373_vm0, %v3441_v59 }
 0x910   : > { %2018 = vmin.xlane.f32.xlu0 %v2017_v60  ;;  %3660 = vmatpush3.msra.mxu0 %v3952_v2 }
 0x911   : > { %3661 = vmatprep.subr.mxu0 %v3955_v3 }
 0x912   : > { %3662 = vmatpush3.msra.mxu0 %v3955_v3 }
 0x913   : > { %3663 = vmatprep.subr.mxu0 %v3960_v5 }
 0x914   : > { %3664 = vmatpush3.msra.mxu0 %v3960_v5 }
 0x915   : > { %3665 = vmatprep.subr.mxu0 %v3965_v7 }
 0x916   : > { %3666 = vmatpush3.msra.mxu0 %v3965_v7 }
 0x917   : > { %3667 = vmatprep.subr.mxu0 %v3971_v8 }
 0x918   : > { %3668 = vmatpush3.msra.mxu0 %v3971_v8 }
 0x919   : > { %3669 = vmatprep.subr.mxu0 %v3976_v10 }
 0x91a   : > { %3670 = vmatpush3.msra.mxu0 %v3976_v10 }
 0x91b   : > { %3671 = vmatprep.subr.mxu0 %v3982_v11 }
 0x91c   : > { %3672 = vmatpush3.msra.mxu0 %v3982_v11 }
 0x91d   : > { %3673 = vmatprep.subr.mxu0 %v3987_v12 }
 0x91e   : > { %3674 = vmatpush3.msra.mxu0 %v3987_v12 }
 0x997   : > { %v2016_v61 = vpop.xlane.xlu1 %2015 }
 0x998   : > { %vm2020_vm1 = vcmp.eq.f32.partialorder %v4182_v56, %v2016_v61 }
 0x999   : > { %v2022_v62 = vsel %vm2020_vm1, %v4023_v46, 64  ;;  %v2019_v0 = vpop.xlane.xlu0 %2018 }
 0x99a   : > { %v2024_v63 = vsel %vm373_vm0, %v2022_v62, 2147483647  ;;  %vm2021_vm2 = vcmp.eq.f32.partialorder %v4189_v58, %v2019_v0 }
 0x99b   : > { %v2026_v1 = vshra.s32 %v2024_v63, 16  ;;  %v2023_v4 = vsel %vm2021_vm2, %v4023_v46, 64  ;;  %v2025_v17 = vand.u32 65535, %v2024_v63 }
 0x99c   : > { %v2039_v6 = vsel %vm373_vm0, %v2023_v4, 2147483647 }
 0x99d   : > { %v2028_v9 = vcvt.s32.f32 %v2026_v1  ;;  %v2041_v13 = vshra.s32 %v2039_v6, 16  ;;  %v2040_v18 = vand.u32 65535, %v2039_v6  ;;  %v2027_v20 = vcvt.s32.f32 %v2025_v17 }
 0x99f   : > { %2029 = vmin.xlane.f32.xlu1 %v2028_v9  ;;  %v2043_v16 = vcvt.s32.f32 %v2041_v13  ;;  %v2042_v24 = vcvt.s32.f32 %v2040_v18 }
 0x9a1   : > { %2044 = vmin.xlane.f32.xlu0 %v2043_v16 }
 0xa28   : > { %v2030_v19 = vpop.xlane.xlu1 %2029 }
 0xa29   : > { %vm2031_vm3 = vcmp.eq.f32.partialorder %v2028_v9, %v2030_v19  ;;  %v2036_v26 = vcvt.f32.s32 %v2030_v19 }
 0xa2a   : > { %v2032_v22 = vsel %vm2031_vm3, %v2027_v20, inf  ;;  %v2045_v23 = vpop.xlane.xlu0 %2044 }
 0xa2b   : > { %2033 = vmin.xlane.f32.xlu1 %v2032_v22  ;;  %vm2046_vm4 = vcmp.eq.f32.partialorder %v2043_v16, %v2045_v23  ;;  %v2051_v27 = vcvt.f32.s32 %v2045_v23  ;;  %v2037_v29 = vshll.u32 %v2036_v26, 16 }
 0xa2c   : > { %v2047_v25 = vsel %vm2046_vm4, %v2042_v24, inf  ;;  %vm829_vm4 = vcmp.eq.s32.totalorder %v4010_v14, 1 }
 0xa2d   : > { %2048 = vmin.xlane.f32.xlu0 %v2047_v25  ;;  %v2052_v33 = vshll.u32 %v2051_v27, 16 }
 0xab4   : > { %v2034_v28 = vpop.xlane.xlu1 %2033 }
 0xab5   : > { %v2035_v30 = vcvt.f32.s32 %v2034_v28 }
 0xab6   : > { %v2049_v32 = vpop.xlane.xlu0 %2048 }
 0xab7   : > { %v2038_v31 = vadd.s32 %v2037_v29, %v2035_v30  ;;  %v2050_v34 = vcvt.f32.s32 %v2049_v32 }
 0xab9   : > { %vm2054_vm5 = vcmp.eq.s32.totalorder %v4023_v46, %v2038_v31  ;;  %v2053_v35 = vadd.s32 %v2052_v33, %v2050_v34  ;;  %v3850_v34 = vmov 1966171168  }
 0xaba   : > { %v3444_v36 = vsel %vm2054_vm5, 1.0, %v3849_v21  ;;  %v4219_v37 = vsel %vm2054_vm5, inf, %v4182_v56  ;;  %vm1157_vm5 = vcmp.eq.s32.totalorder %v4010_v14, 2 }
 0xabb   : > { %3656 = vmatprep.mubr.msk.f32.mxu1 %vm373_vm0, %v3444_v36  ;;  %v2342_v38 = vsel %vm373_vm0, %v4219_v37, inf  ;;  %vm2055_vm6 = vcmp.eq.s32.totalorder %v4023_v46, %v2053_v35  ;;  %v506_v35 = vunpack.c.l.s4 %v3850_v34 }
 0xabc   : > { %2343 = vmin.xlane.f32.xlu1 %v2342_v38  ;;  %v4226_v39 = vsel %vm2055_vm6, inf, %v4189_v58  ;;  %v3445_v40 = vsel %vm2055_vm6, 1.0, %v3849_v21  ;;  %vm1485_vm6 = vcmp.eq.s32.totalorder %v4010_v14, 3 }
 0xabd   : > { %v2345_v41 = vsel %vm373_vm0, %v4226_v39, inf  ;;  %3657 = vmatmul.mubr.msk.f32.vlgmr.msra.gmra.mxu1 %vm373_vm0, %v3445_v40  ;;  %v507_v36 = vunpack.c.0.s8 %v506_v35 }
 0xabe   : > { %2346 = vmin.xlane.f32.xlu0 %v2345_v41  ;;  %3679 = vmatpush3.msra.mxu1 %v3952_v2 }
 0xabf   : > { %3680 = vmatprep.subr.mxu1 %v3955_v3  ;;  %v4279_v38 = vsub.s32 %v507_v36, %v4010_v14 }
 0xac0   : > { %3681 = vmatpush3.msra.mxu1 %v3955_v3 }
 0xac1   : > { %3682 = vmatprep.subr.mxu1 %v3960_v5 }
 0xac2   : > { %3683 = vmatpush3.msra.mxu1 %v3960_v5 }
 0xac3   : > { %3684 = vmatprep.subr.mxu1 %v3965_v7 }
 0xac4   : > { %3685 = vmatpush3.msra.mxu1 %v3965_v7 }
 0xac5   : > { %3686 = vmatprep.subr.mxu1 %v3971_v8 }
 0xac6   : > { %3687 = vmatpush3.msra.mxu1 %v3971_v8 }
 0xac7   : > { %3688 = vmatprep.subr.mxu1 %v3976_v10 }
 0xac8   : > { %3689 = vmatpush3.msra.mxu1 %v3976_v10 }
 0xac9   : > { %3690 = vmatprep.subr.mxu1 %v3982_v11 }
 0xaca   : > { %3691 = vmatpush3.msra.mxu1 %v3982_v11 }
 0xacb   : > { %3692 = vmatprep.subr.mxu1 %v3987_v12 }
 0xacc   : > { %3693 = vmatpush3.msra.mxu1 %v3987_v12 }
 0xb45   : > { %v2344_v2 = vpop.xlane.xlu1 %2343 }
 0xb46   : > { %vm2348_vm7 = vcmp.eq.f32.partialorder %v4219_v37, %v2344_v2 }
 0xb47   : > { %v2350_v3 = vsel %vm2348_vm7, %v4023_v46, 64  ;;  %v2347_v7 = vpop.xlane.xlu0 %2346  ;;  %vm1813_vm7 = vcmp.eq.s32.totalorder %v4010_v14, 4 }
 0xb48   : > { %v2352_v5 = vsel %vm373_vm0, %v2350_v3, 2147483647  ;;  %vm2349_vm8 = vcmp.eq.f32.partialorder %v4226_v39, %v2347_v7 }
 0xb49   : > { %v2354_v8 = vshra.s32 %v2352_v5, 16  ;;  %v2351_v10 = vsel %vm2349_vm8, %v4023_v46, 64  ;;  %v2353_v12 = vand.u32 65535, %v2352_v5  ;;  %vm2141_vm8 = vcmp.eq.s32.totalorder %v4010_v14, 5 }
 0xb4a   : > { %v2367_v42 = vsel %vm373_vm0, %v2351_v10, 2147483647 }
 0xb4b   : > { %v2356_v11 = vcvt.s32.f32 %v2354_v8  ;;  %v2369_v43 = vshra.s32 %v2367_v42, 16  ;;  %v2368_v45 = vand.u32 65535, %v2367_v42  ;;  %v2355_v48 = vcvt.s32.f32 %v2353_v12  ;;  %v312_v12 = vld [vmem:[%s297_s26 + $0x8] sm:$0xff] }
 0xb4d   : > { %2357 = vmin.xlane.f32.xlu1 %v2356_v11  ;;  %v2371_v44 = vcvt.s32.f32 %v2369_v43  ;;  %v2370_v51 = vcvt.s32.f32 %v2368_v45 }
 0xb4f   : > { %2372 = vmin.xlane.f32.xlu0 %v2371_v44 }
 0xbd6   : > { %v2358_v47 = vpop.xlane.xlu1 %2357 }
 0xbd7   : > { %vm2359_vm9 = vcmp.eq.f32.partialorder %v2356_v11, %v2358_v47  ;;  %v2364_v53 = vcvt.f32.s32 %v2358_v47 }
 0xbd8   : > { %v2360_v49 = vsel %vm2359_vm9, %v2355_v48, inf  ;;  %v2373_v50 = vpop.xlane.xlu0 %2372  ;;  %v3054_v48 = vrot.slane %v312_v12, %v4279_v38  ;;  %vm2469_vm9 = vcmp.eq.s32.totalorder %v4010_v14, 6 }
 0xbd9   : > { %2361 = vmin.xlane.f32.xlu1 %v2360_v49  ;;  %vm2374_vm10 = vcmp.eq.f32.partialorder %v2371_v44, %v2373_v50  ;;  %v2379_v54 = vcvt.f32.s32 %v2373_v50  ;;  %v2365_v56 = vshll.u32 %v2364_v53, 16  ;;  %v3047_v53 = vcombine.high %v312_v12, %v312_v12  ;;  %v3582_v12 = vpop.f32.mrf.mxu1 }
 0xbda   : > { %v2375_v52 = vsel %vm2374_vm10, %v2370_v51, inf  ;;  %vm2797_vm10 = vcmp.eq.s32.totalorder %v4010_v14, 7 }
 0xbdb   : > { %2376 = vmin.xlane.f32.xlu0 %v2375_v52  ;;  %v2380_v60 = vshll.u32 %v2379_v54, 16  ;;  %v3070_v52 = vrot.slane %v3054_v48, %v4279_v38 }
 0xc62   : > { %v2362_v55 = vpop.xlane.xlu1 %2361 }
 0xc63   : > { %v2363_v57 = vcvt.f32.s32 %v2362_v55 }
 0xc64   : > { %v2377_v59 = vpop.xlane.xlu0 %2376 }
 0xc65   : > { %v2366_v58 = vadd.s32 %v2365_v56, %v2363_v57  ;;  %v2378_v61 = vcvt.f32.s32 %v2377_v59  ;;  %v3062_v56 = vcombine.high %v3054_v48, %v3054_v48  ;;  %v4323_v57 = vrot.slane %v3070_v52, %v4016_v15 }
 0xc66   : > { %v3061_v59 = vrot.slane %v3047_v53, %v4279_v38 }
 0xc67   : > { %vm2382_vm11 = vcmp.eq.s32.totalorder %v4023_v46, %v2366_v58  ;;  %v2381_v62 = vadd.s32 %v2380_v60, %v2378_v61  ;;  %v3092_v58 = vcombine.high %v3070_v52, %v3070_v52  ;;  %v3084_v61 = vrot.slane %v3062_v56, %v4279_v38 }
 0xc68   : > { %v3448_v63 = vsel %vm2382_vm11, 1.0, %v3849_v21  ;;  %v2668_v0 = vsel %vm2382_vm11, inf, %v4219_v37  ;;  %v311_v37 = vld [vmem:[%s297_s26] sm:$0xff]  ;;  %vm3192_vm11 = vcmask 130048  }
 0xc69   : > { %3675 = vmatprep.mubr.msk.f32.mxu0 %vm373_vm0, %v3448_v63  ;;  %v2670_v1 = vsel %vm373_vm0, %v2668_v0, inf  ;;  %vm2383_vm12 = vcmp.eq.s32.totalorder %v4023_v46, %v2381_v62  ;;  %v2998_v40 = vcombine.high %v311_v37, %v311_v37  ;;  %v4335_v62 = vrot.slane %v3092_v58, %v4016_v15 }
 0xc6a   : > { %2671 = vmin.xlane.f32.xlu1 %v2670_v1  ;;  %v2669_v4 = vsel %vm2383_vm12, inf, %v4226_v39  ;;  %v3449_v6 = vsel %vm2383_vm12, 1.0, %v3849_v21  ;;  %v3005_v39 = vrot.slane %v311_v37, %v4279_v38  ;;  %v3077_v63 = vrot.slane %v3061_v59, %v4279_v38 }
 0xc6b   : > { %v2673_v9 = vsel %vm373_vm0, %v2669_v4, inf  ;;  %3676 = vmatmul.mubr.msk.f32.vlgmr.msra.gmra.mxu0 %vm373_vm0, %v3449_v6  ;;  %v3012_v2 = vrot.slane %v2998_v40, %v4279_v38  ;;  %v3094_v1 = vcombine.high %v3084_v61, %v3084_v61  ;;  %vm3257_vm12 = vcmask 261248  }
 0xc6c   : > { %2674 = vmin.xlane.f32.xlu0 %v2673_v9  ;;  %v3013_v41 = vcombine.high %v3005_v39, %v3005_v39  ;;  %v3021_v3 = vrot.slane %v3005_v39, %v4279_v38  ;;  %v4346_v6 = vrot.slane %v3077_v63, %v4016_v15  ;;  %v3093_v9 = vcombine.high %v3077_v63, %v3077_v63 }
 0xc6d   : > { %v3028_v42 = vrot.slane %v3012_v2, %v4279_v38  ;;  %v3014_v44 = vcombine.high %v3012_v2, %v3012_v2 }
 0xc6e   : > { %v3035_v5 = vrot.slane %v3013_v41, %v4279_v38  ;;  %v4286_v7 = vrot.slane %v3021_v3, %v4016_v15  ;;  %v3043_v8 = vcombine.high %v3021_v3, %v3021_v3 }
 0xc6f   : > { %v4300_v45 = vrot.slane %v3028_v42, %v4016_v15  ;;  %v3044_v47 = vcombine.high %v3028_v42, %v3028_v42  ;;  %v3042_v50 = vrot.slane %v3014_v44, %v4279_v38 }
 0xc70   : > { %v4289_v10 = vrot.slane %v3035_v5, %v4016_v15  ;;  %v4295_v11 = vrot.slane %v3043_v8, %v4016_v15  ;;  %v3045_v43 = vcombine.high %v3035_v5, %v3035_v5 }
 0xc71   : > { %v4312_v51 = vrot.slane %v3044_v47, %v4016_v15  ;;  %v4318_v54 = vrot.slane %v3042_v50, %v4016_v15  ;;  %v3046_v55 = vcombine.high %v3042_v50, %v3042_v50 }
 0xc72   : > { %v4306_v49 = vrot.slane %v3045_v43, %v4016_v15 }
 0xc73   : > { %v4329_v60 = vrot.slane %v3046_v55, %v4016_v15 }
 0xcf3   : > { %v2672_v13 = vpop.xlane.xlu1 %2671 }
 0xcf4   : > { %vm2676_vm13 = vcmp.eq.f32.partialorder %v2668_v0, %v2672_v13  ;;  %v4341_v0 = vrot.slane %v3084_v61, %v4016_v15  ;;  %v4351_v13 = vrot.slane %v3094_v1, %v4016_v15  ;;  %v888_v61 = vrot.slane %v3582_v12, %v4279_v38 }
 0xcf5   : > { %v2678_v16 = vsel %vm2676_vm13, %v4023_v46, 64  ;;  %v2675_v18 = vpop.xlane.xlu0 %2674 }
 0xcf6   : > { %v2680_v17 = vsel %vm373_vm0, %v2678_v16, 2147483647  ;;  %vm2677_vm14 = vcmp.eq.f32.partialorder %v2669_v4, %v2675_v18  ;;  %v3063_v4 = vcombine.high %v3061_v59, %v3061_v59  ;;  %v881_v59 = vcombine.high %v3582_v12, %v3582_v12 }
 0xcf7   : > { %v2682_v19 = vshra.s32 %v2680_v17, 16  ;;  %v2679_v20 = vsel %vm2677_vm14, %v4023_v46, 64  ;;  %v2681_v26 = vand.u32 65535, %v2680_v17  ;;  %v4357_v17 = vrot.slane %v3093_v9, %v4016_v15 }
 0xcf8   : > { %v2695_v22 = vsel %vm373_vm0, %v2679_v20, 2147483647  ;;  %v3091_v16 = vrot.slane %v3063_v4, %v4279_v38 }
 0xcf9   : > { %v2684_v23 = vcvt.s32.f32 %v2682_v19  ;;  %v2697_v24 = vshra.s32 %v2695_v22, 16  ;;  %v2696_v27 = vand.u32 65535, %v2695_v22  ;;  %v2683_v29 = vcvt.s32.f32 %v2681_v26  ;;  %5283 = vst [vmem:[#allocation5_spill] sm:$0xff] %v4357_v17 }
 0xcfa   : > { %v4362_v18 = vrot.slane %v3091_v16, %v4016_v15  ;;  %v3095_v19 = vcombine.high %v3091_v16, %v3091_v16 }
 0xcfb   : > { %2685 = vmin.xlane.f32.xlu1 %v2684_v23  ;;  %v2699_v25 = vcvt.s32.f32 %v2697_v24  ;;  %v2698_v32 = vcvt.s32.f32 %v2696_v27 }
 0xcfc   : > { %v4369_v20 = vrot.slane %v3095_v19, %v4016_v15 }
 0xcfd   : > { %2700 = vmin.xlane.f32.xlu0 %v2699_v25 }
 0xcfe   : > { %5284 = vst [vmem:[#allocation6_spill] sm:$0xff] %v4369_v20 }
 0xd84   : > { %v4267_v28 = vpop.xlane.xlu1 %2685 }
 0xd85   : > { %vm2687_vm15 = vcmp.eq.f32.partialorder %v2684_v23, %v4267_v28  ;;  %v2692_v22 = vcvt.f32.s32 %v4267_v28 }
 0xd86   : > { %v2688_v30 = vsel %vm2687_vm15, %v2683_v29, inf  ;;  %v4270_v31 = vpop.xlane.xlu0 %2700 }
 0xd87   : > { %2689 = vmin.xlane.f32.xlu1 %v2688_v30  ;;  %vm2702_vm1 = vcmp.eq.f32.partialorder %v2699_v25, %v4270_v31  ;;  %v2707_v23 = vcvt.f32.s32 %v4270_v31  ;;  %v2693_v25 = vshll.u32 %v2692_v22, 16  ;;  %v3563_v31 = vpop.f32.mrf.mxu0 }
 0xd88   : > { %v2703_v33 = vsel %vm2702_vm1, %v2698_v32, inf  ;;  %v553_v35 = vcombine.high %v3563_v31, %v3563_v31  ;;  %v560_v36 = vrot.slane %v3563_v31, %v4279_v38 }
 0xd89   : > { %2704 = vmin.xlane.f32.xlu0 %v2703_v33  ;;  %v2708_v30 = vshll.u32 %v2707_v23, 16  ;;  %v492_v37 = vpop.f32.mrf.mxu0 }
 0xd8a   : > { %v567_v39 = vrot.slane %v553_v35, %v4279_v38  ;;  %v568_v40 = vcombine.high %v560_v36, %v560_v36  ;;  %v504_v41 = vcombine.high %v492_v37, %v492_v37  ;;  %v576_v2 = vrot.slane %v560_v36, %v4279_v38 }
 0xd8c   : > { %v569_v3 = vcombine.high %v567_v39, %v567_v39  ;;  %v590_v5 = vrot.slane %v568_v40, %v4279_v38  ;;  %v518_v8 = vrot.slane %v504_v41, %v4279_v38  ;;  %v598_v42 = vcombine.high %v576_v2, %v576_v2 }
 0xd8d   : > { %v639_v47 = vrot.slane %v576_v2, %v4016_v15 }
 0xd8e   : > { %v597_v43 = vrot.slane %v569_v3, %v4279_v38  ;;  %v600_v44 = vcombine.high %v590_v5, %v590_v5  ;;  %v643_v52 = vrot.slane %v590_v5, %v4016_v15  ;;  %v520_v53 = vcombine.high %v518_v8, %v518_v8 }
 0xd8f   : > { %v647_v56 = vrot.slane %v598_v42, %v4016_v15  ;;  %v534_v58 = vrot.slane %v518_v8, %v4279_v38  ;;  %v904_v3 = vrot.slane %v888_v61, %v4279_v38 }
 0xd90   : > { %v601_v63 = vcombine.high %v597_v43, %v597_v43  ;;  %v651_v1 = vrot.slane %v600_v44, %v4016_v15  ;;  %v659_v9 = vrot.slane %v597_v43, %v4016_v15 }
 0xd98   : > { %3209 = vrot.lane.b32.xlu1 %v4286_v7, %s3851_s29 }
 0xd9c   : > { %3213 = vrot.lane.b32.xlu1 %v4295_v11, %s3851_s29 }
 0xd9f   : > { %3211 = vrot.lane.b32.xlu0 %v4289_v10, %s3851_s29 }
 0xda0   : > { %3215 = vrot.lane.b32.xlu1 %v4306_v49, %s3851_s29 }
 0xda3   : > { %3217 = vrot.lane.b32.xlu0 %v4300_v45, %s3851_s29 }
 0xda4   : > { %3219 = vrot.lane.b32.xlu1 %v4318_v54, %s3851_s29 }
 0xda7   : > { %3221 = vrot.lane.b32.xlu0 %v4312_v51, %s3851_s29 }
 0xda8   : > { %3223 = vrot.lane.b32.xlu1 %v4329_v60, %s3851_s29 }
 0xdab   : > { %3225 = vrot.lane.b32.xlu0 %v4323_v57, %s3851_s29 }
 0xdac   : > { %3227 = vrot.lane.b32.xlu1 %v4341_v0, %s3851_s29 }
 0xdaf   : > { %3229 = vrot.lane.b32.xlu0 %v4335_v62, %s3851_s29 }
 0xdb0   : > { %3231 = vrot.lane.b32.xlu1 %v4351_v13, %s3851_s29 }
 0xdb3   : > { %3233 = vrot.lane.b32.xlu0 %v4346_v6, %s3851_s29 }
 0xdb4   : > { %3235 = vrot.lane.b32.xlu1 %v4362_v18, %s3851_s29 }
 0xdb7   : > { %3237 = vrot.lane.b32.xlu0 %v4357_v17, %s3851_s29 }
 0xdb8   : > { %3239 = vrot.lane.b32.xlu1 %v4369_v20, %s3851_s29 }
 0xe10   : > { %v2690_v24 = vpop.xlane.xlu1 %2689 }
 0xe11   : > { %v2691_v26 = vcvt.f32.s32 %v2690_v24  ;;  %v548_v24 = vrot.slane %v520_v53, %v4279_v38 }
 0xe12   : > { %v2705_v29 = vpop.xlane.xlu0 %2704 }
 0xe13   : > { %v2694_v27 = vadd.s32 %v2693_v25, %v2691_v26  ;;  %v2706_v32 = vcvt.f32.s32 %v2705_v29  ;;  %v820_v26 = vpop.f32.mrf.mxu1  ;;  %v550_v29 = vcombine.high %v534_v58, %v534_v58  ;;  %v552_v40 = vcombine.high %v548_v24, %v548_v24 }
 0xe14   : > { %v627_v5 = vrot.slane %v548_v24, %v4016_v15  ;;  %v839_v12 = vrot.slane %v820_v26, %v4279_v38 }
 0xe15   : > { %vm2710_vm2 = vcmp.eq.s32.totalorder %v4023_v46, %v2694_v27  ;;  %v2709_v33 = vadd.s32 %v2708_v30, %v2706_v32  ;;  %v895_v30 = vrot.slane %v881_v59, %v4279_v38  ;;  %v896_v32 = vcombine.high %v888_v61, %v888_v61  ;;  %v3601_v59 = vpop.f32.mrf.mxu0 }
 0xe16   : > { %v3452_v34 = vsel %vm2710_vm2, 1.0, %v3849_v21  ;;  %v635_v53 = vrot.slane %v552_v40, %v4016_v15 }
 0xe17   : > { %3694 = vmatprep.mubr.msk.f32.mxu1 %vm373_vm0, %v3452_v34  ;;  %vm2711_vm3 = vcmp.eq.s32.totalorder %v4023_v46, %v2709_v33  ;;  %v511_v46 = vrot.slane %v492_v37, %v4279_v38  ;;  %v667_v33 = vrot.slane %v601_v63, %v4016_v15  ;;  %v623_v37 = vrot.slane %v534_v58, %v4016_v15 }
 0xe18   : > { %v3453_v28 = vsel %vm2711_vm3, 1.0, %v3849_v21  ;;  %v583_v21 = vrot.slane %v567_v39, %v4279_v38  ;;  %v832_v39 = vcombine.high %v820_v26, %v820_v26  ;;  %v918_v8 = vrot.slane %v896_v32, %v4279_v38 }
 0xe19   : > { %3695 = vmatmul.mubr.msk.f32.vlgmr.msra.gmra.mxu1 %vm373_vm0, %v3453_v28  ;;  %vm501_vm0 = vcmp.eq.s32.totalorder %v4010_v14, 0  ;;  %v519_v48 = vcombine.high %v511_v46, %v511_v46  ;;  %v527_v55 = vrot.slane %v511_v46, %v4279_v38  ;;  %v631_v46 = vrot.slane %v550_v29, %v4016_v15 }
 0xe1a   : > { %v599_v50 = vcombine.high %v583_v21, %v583_v21  ;;  %v655_v4 = vrot.slane %v583_v21, %v4016_v15  ;;  %v4401_v16 = vsel %vm501_vm0, %v639_v47, 0.0  ;;  %v4407_v23 = vsel %vm501_vm0, %v643_v52, 0.0 }
 0xe1b   : > { %v541_v19 = vrot.slane %v519_v48, %v4279_v38  ;;  %v549_v25 = vcombine.high %v527_v55, %v527_v55  ;;  %v4412_v27 = vsel %vm501_vm0, %v647_v56, 0.0  ;;  %v4418_v34 = vsel %vm501_vm0, %v651_v1, 0.0 }
 0xe1c   : > { %v663_v22 = vrot.slane %v599_v50, %v4016_v15  ;;  %v696_v28 = vsel %vm501_vm0, %v655_v4, 0.0  ;;  %v697_v31 = vsel %vm501_vm0, %v659_v9, 0.0  ;;  %v607_v36 = vrot.slane %v527_v55, %v4016_v15 }
 0xe1d   : > { %v551_v35 = vcombine.high %v541_v19, %v541_v19  ;;  %v611_v41 = vrot.slane %v541_v19, %v4016_v15  ;;  %v615_v2 = vrot.slane %v549_v25, %v4016_v15  ;;  %v897_v21 = vcombine.high %v895_v30, %v895_v30 }
 0xe1e   : > { %v698_v42 = vsel %vm501_vm0, %v663_v22, 0.0  ;;  %v699_v43 = vsel %vm501_vm0, %v667_v33, 0.0  ;;  %v911_v44 = vrot.slane %v895_v30, %v4279_v38  ;;  %v4441_v48 = vsel %vm501_vm0, %v607_v36, 0.0 }
 0xe1f   : > { %v619_v47 = vrot.slane %v551_v35, %v4016_v15  ;;  %v4445_v50 = vsel %vm501_vm0, %v623_v37, 0.0  ;;  %v846_v52 = vrot.slane %v832_v39, %v4279_v38  ;;  %v4451_v55 = vsel %vm501_vm0, %v611_v41, 0.0 }
 0xe20   : > { %v4455_v56 = vsel %vm501_vm0, %v615_v2, 0.0  ;;  %v926_v58 = vcombine.high %v904_v3, %v904_v3  ;;  %v4459_v61 = vsel %vm501_vm0, %v627_v5, 0.0  ;;  %v4463_v63 = vsel %vm501_vm0, %v631_v46, 0.0  ;;  %v1148_v46 = vpop.f32.mrf.mxu0 }
 0xe21   : > { %v925_v1 = vrot.slane %v897_v21, %v4279_v38  ;;  %v928_v4 = vcombine.high %v918_v8, %v918_v8  ;;  %v927_v9 = vcombine.high %v911_v44, %v911_v44  ;;  %v967_v19 = vrot.slane %v904_v3, %v4016_v15 }
 0xe22   : > { %v847_v22 = vcombine.high %v839_v12, %v839_v12  ;;  %v971_v24 = vrot.slane %v918_v8, %v4016_v15  ;;  %v848_v25 = vcombine.high %v846_v52, %v846_v52  ;;  %v855_v26 = vrot.slane %v839_v12, %v4279_v38 }
 0xe23   : > { %v1209_v29 = vcombine.high %v3601_v59, %v3601_v59  ;;  %v975_v30 = vrot.slane %v926_v58, %v4016_v15  ;;  %v983_v32 = vrot.slane %v911_v44, %v4016_v15  ;;  %v862_v33 = vrot.slane %v846_v52, %v4279_v38 }
 0xe24   : > { %v1216_v35 = vrot.slane %v3601_v59, %v4279_v38  ;;  %v4476_v36 = vsel %vm501_vm0, %v619_v47, 0.0  ;;  %v929_v37 = vcombine.high %v925_v1, %v925_v1  ;;  %v979_v39 = vrot.slane %v928_v4, %v4016_v15 }
 0xe25   : > { %v987_v40 = vrot.slane %v925_v1, %v4016_v15  ;;  %v691_v41 = vsel %vm501_vm0, %v635_v53, 0.0  ;;  %v991_v2 = vrot.slane %v927_v9, %v4016_v15  ;;  %v1020_v3 = vsel %vm829_vm4, %v967_v19, %v4401_v16 }
 0xe26   : > { %v869_v5 = vrot.slane %v847_v22, %v4279_v38  ;;  %v4490_v21 = vsel %vm829_vm4, %v971_v24, %v4407_v23  ;;  %v876_v8 = vrot.slane %v848_v25, %v4279_v38  ;;  %v877_v44 = vcombine.high %v855_v26, %v855_v26 }
 0xe27   : > { %v1223_v12 = vrot.slane %v1209_v29, %v4279_v38  ;;  %v1022_v47 = vsel %vm829_vm4, %v975_v30, %v4412_v27  ;;  %v4499_v16 = vsel %vm829_vm4, %v983_v32, %v696_v28  ;;  %v878_v52 = vcombine.high %v862_v33, %v862_v33 }
 0xe28   : > { %v1224_v53 = vcombine.high %v1216_v35, %v1216_v35  ;;  %v995_v58 = vrot.slane %v929_v37, %v4016_v15  ;;  %v1023_v23 = vsel %vm829_vm4, %v979_v39, %v4418_v34  ;;  %v1025_v59 = vsel %vm829_vm4, %v987_v40, %v697_v31 }
 0xe29   : > { %v1160_v1 = vcombine.high %v1148_v46, %v1148_v46  ;;  %v879_v4 = vcombine.high %v869_v5, %v869_v5  ;;  %v935_v9 = vrot.slane %v855_v26, %v4016_v15  ;;  %v951_v27 = vrot.slane %v862_v33, %v4016_v15 }
 0xe2a   : > { %v1232_v28 = vrot.slane %v1216_v35, %v4279_v38  ;;  %v880_v19 = vcombine.high %v876_v8, %v876_v8  ;;  %v939_v22 = vrot.slane %v869_v5, %v4016_v15  ;;  %v943_v24 = vrot.slane %v877_v44, %v4016_v15 }
 0xe2b   : > { %v1225_v25 = vcombine.high %v1223_v12, %v1223_v12  ;;  %v4514_v34 = vsel %vm829_vm4, %v991_v2, %v698_v42  ;;  %v955_v31 = vrot.slane %v876_v8, %v4016_v15  ;;  %v959_v29 = vrot.slane %v878_v52, %v4016_v15  ;;  %v3620_v8 = vpop.f32.mrf.mxu1 }
 0xe2c   : > { %v1246_v26 = vrot.slane %v1224_v53, %v4279_v38  ;;  %v1027_v30 = vsel %vm829_vm4, %v995_v58, %v699_v43  ;;  %v1239_v32 = vrot.slane %v1223_v12, %v4279_v38  ;;  %v1167_v33 = vrot.slane %v1148_v46, %v4279_v38 }
 0xe2d   : > { %v1174_v35 = vrot.slane %v1160_v1, %v4279_v38  ;;  %v947_v37 = vrot.slane %v879_v4, %v4016_v15  ;;  %v1012_v42 = vsel %vm829_vm4, %v935_v9, %v4441_v48  ;;  %v4531_v39 = vsel %vm829_vm4, %v951_v27, %v4445_v50 }
 0xe2e   : > { %v1254_v40 = vcombine.high %v1232_v28, %v1232_v28  ;;  %v963_v43 = vrot.slane %v880_v19, %v4016_v15  ;;  %v1013_v2 = vsel %vm829_vm4, %v939_v22, %v4451_v55  ;;  %v1014_v5 = vsel %vm829_vm4, %v943_v24, %v4455_v56 }
 0xe2f   : > { %v1253_v46 = vrot.slane %v1225_v25, %v4279_v38  ;;  %v1017_v48 = vsel %vm829_vm4, %v955_v31, %v4459_v61  ;;  %v1018_v50 = vsel %vm829_vm4, %v959_v29, %v4463_v63  ;;  %v1256_v44 = vcombine.high %v1246_v26, %v1246_v26 }
 0xe30   : > { %v1255_v12 = vcombine.high %v1239_v32, %v1239_v32  ;;  %v1295_v55 = vrot.slane %v1232_v28, %v4016_v15  ;;  %v1175_v52 = vcombine.high %v1167_v33, %v1167_v33  ;;  %v1176_v53 = vcombine.high %v1174_v35, %v1174_v35 }
 0xe31   : > { %v1299_v56 = vrot.slane %v1246_v26, %v4016_v15  ;;  %v1303_v58 = vrot.slane %v1254_v40, %v4016_v15  ;;  %v1183_v1 = vrot.slane %v1167_v33, %v4279_v38  ;;  %v1537_v4 = vcombine.high %v3620_v8, %v3620_v8 }
 0xe32   : > { %v1257_v61 = vcombine.high %v1253_v46, %v1253_v46  ;;  %v1311_v9 = vrot.slane %v1239_v32, %v4016_v15  ;;  %v1190_v63 = vrot.slane %v1174_v35, %v4279_v38  ;;  %v1544_v27 = vrot.slane %v3620_v8, %v4279_v38  ;;  %v1476_v32 = vpop.f32.mrf.mxu1 }
 0xe33   : > { %v1015_v28 = vsel %vm829_vm4, %v947_v37, %v4476_v36  ;;  %v4560_v19 = vsel %vm829_vm4, %v963_v43, %v691_v41  ;;  %v1307_v22 = vrot.slane %v1256_v44, %v4016_v15  ;;  %v1315_v24 = vrot.slane %v1253_v46, %v4016_v15 }
 0xe34   : > { %v1319_v25 = vrot.slane %v1255_v12, %v4016_v15  ;;  %v1348_v31 = vsel %vm1157_vm5, %v1295_v55, %v1020_v3  ;;  %v1197_v29 = vrot.slane %v1175_v52, %v4279_v38  ;;  %v1204_v26 = vrot.slane %v1176_v53, %v4279_v38 }
 0xe35   : > { %v1349_v36 = vsel %vm1157_vm5, %v1299_v56, %v4490_v21  ;;  %v1350_v41 = vsel %vm1157_vm5, %v1303_v58, %v1022_v47  ;;  %v1205_v33 = vcombine.high %v1183_v1, %v1183_v1  ;;  %v1551_v35 = vrot.slane %v1537_v4, %v4279_v38 }
 0xe36   : > { %v1323_v37 = vrot.slane %v1257_v61, %v4016_v15  ;;  %v4579_v3 = vsel %vm1157_vm5, %v1311_v9, %v4499_v16  ;;  %v1206_v40 = vcombine.high %v1190_v63, %v1190_v63  ;;  %v1552_v43 = vcombine.high %v1544_v27, %v1544_v27 }
 0xe37   : > { %v4583_v46 = vsel %vm1157_vm5, %v1307_v22, %v1023_v23  ;;  %v4587_v21 = vsel %vm1157_vm5, %v1315_v24, %v1025_v59  ;;  %v1263_v47 = vrot.slane %v1183_v1, %v4016_v15  ;;  %v1488_v8 = vcombine.high %v1476_v32, %v1476_v32 }
 0xe38   : > { %v1207_v44 = vcombine.high %v1197_v29, %v1197_v29  ;;  %v1208_v12 = vcombine.high %v1204_v26, %v1204_v26  ;;  %v1279_v55 = vrot.slane %v1190_v63, %v4016_v15  ;;  %v1560_v16 = vrot.slane %v1544_v27, %v4279_v38 }
 0xe39   : > { %v1267_v52 = vrot.slane %v1197_v29, %v4016_v15  ;;  %v1271_v53 = vrot.slane %v1205_v33, %v4016_v15  ;;  %v1283_v23 = vrot.slane %v1204_v26, %v4016_v15  ;;  %v1553_v56 = vcombine.high %v1551_v35, %v1551_v35 }
 0xe3a   : > { %v4598_v59 = vsel %vm1157_vm5, %v1319_v25, %v4514_v34  ;;  %v4602_v58 = vsel %vm1157_vm5, %v1323_v37, %v1027_v30  ;;  %v1287_v1 = vrot.slane %v1206_v40, %v4016_v15  ;;  %v1574_v4 = vrot.slane %v1552_v43, %v4279_v38 }
 0xe3b   : > { %v4608_v61 = vsel %vm1157_vm5, %v1263_v47, %v1012_v42  ;;  %v1567_v9 = vrot.slane %v1551_v35, %v4279_v38  ;;  %v1495_v63 = vrot.slane %v1476_v32, %v4279_v38  ;;  %v1502_v27 = vrot.slane %v1488_v8, %v4279_v38  ;;  %v3639_v32 = vpop.f32.mrf.mxu0 }
 0xe3c   : > { %v1275_v34 = vrot.slane %v1207_v44, %v4016_v15  ;;  %v1291_v22 = vrot.slane %v1208_v12, %v4016_v15  ;;  %v1344_v30 = vsel %vm1157_vm5, %v1279_v55, %v4531_v39  ;;  %v1582_v24 = vcombine.high %v1560_v16, %v1560_v16 }
 0xe3d   : > { %v1341_v25 = vsel %vm1157_vm5, %v1267_v52, %v1013_v2  ;;  %v4622_v42 = vsel %vm1157_vm5, %v1271_v53, %v1014_v5  ;;  %v4626_v29 = vsel %vm1157_vm5, %v1283_v23, %v1017_v48  ;;  %v1581_v26 = vrot.slane %v1553_v56, %v4279_v38 }
 0xe3e   : > { %v4631_v33 = vsel %vm1157_vm5, %v1287_v1, %v1018_v50  ;;  %v1584_v39 = vcombine.high %v1574_v4, %v1574_v4  ;;  %v1623_v2 = vrot.slane %v1560_v16, %v4016_v15  ;;  %v1583_v35 = vcombine.high %v1567_v9, %v1567_v9  ;;  %v1804_v16 = vpop.f32.mrf.mxu0 }
 0xe3f   : > { %v1627_v5 = vrot.slane %v1574_v4, %v4016_v15  ;;  %v1503_v37 = vcombine.high %v1495_v63, %v1495_v63  ;;  %v1504_v40 = vcombine.high %v1502_v27, %v1502_v27  ;;  %v4638_v48 = vsel %vm1157_vm5, %v1275_v34, %v1015_v28 }
 0xe40   : > { %v1631_v43 = vrot.slane %v1582_v24, %v4016_v15  ;;  %v1511_v47 = vrot.slane %v1495_v63, %v4279_v38  ;;  %v1865_v50 = vcombine.high %v3639_v32, %v3639_v32  ;;  %v1585_v8 = vcombine.high %v1581_v26, %v1581_v26 }
 0xe41   : > { %v1639_v44 = vrot.slane %v1567_v9, %v4016_v15  ;;  %v1518_v12 = vrot.slane %v1502_v27, %v4279_v38  ;;  %v1872_v55 = vrot.slane %v3639_v32, %v4279_v38  ;;  %v4648_v52 = vsel %vm1157_vm5, %v1291_v22, %v4560_v19 }
 0xe42   : > { %v1635_v28 = vrot.slane %v1584_v39, %v4016_v15  ;;  %v1643_v53 = vrot.slane %v1581_v26, %v4016_v15  ;;  %v4654_v23 = vsel %vm1485_vm6, %v1623_v2, %v1348_v31  ;;  %v1647_v56 = vrot.slane %v1583_v35, %v4016_v15 }
 0xe43   : > { %v4659_v1 = vsel %vm1485_vm6, %v1627_v5, %v1349_v36  ;;  %v1525_v4 = vrot.slane %v1503_v37, %v4279_v38  ;;  %v1532_v9 = vrot.slane %v1504_v40, %v4279_v38  ;;  %v4665_v19 = vsel %vm1485_vm6, %v1631_v43, %v1350_v41 }
 0xe44   : > { %v1533_v63 = vcombine.high %v1511_v47, %v1511_v47  ;;  %v1879_v27 = vrot.slane %v1865_v50, %v4279_v38  ;;  %v1816_v34 = vcombine.high %v1804_v16, %v1804_v16  ;;  %v1651_v31 = vrot.slane %v1585_v8, %v4016_v15 }
 0xe45   : > { %v4672_v22 = vsel %vm1485_vm6, %v1639_v44, %v4579_v3  ;;  %v1534_v36 = vcombine.high %v1518_v12, %v1518_v12  ;;  %v1880_v24 = vcombine.high %v1872_v55, %v1872_v55  ;;  %v4677_v26 = vsel %vm1485_vm6, %v1635_v28, %v4583_v46 }
 0xe46   : > { %v4682_v41 = vsel %vm1485_vm6, %v1643_v53, %v4587_v21  ;;  %v1591_v32 = vrot.slane %v1511_v47, %v4016_v15  ;;  %v1607_v39 = vrot.slane %v1518_v12, %v4016_v15  ;;  %v1535_v2 = vcombine.high %v1525_v4, %v1525_v4 }
 0xe47   : > { %v1536_v35 = vcombine.high %v1532_v9, %v1532_v9  ;;  %v1595_v3 = vrot.slane %v1525_v4, %v4016_v15  ;;  %v1888_v5 = vrot.slane %v1872_v55, %v4279_v38  ;;  %v1599_v37 = vrot.slane %v1533_v63, %v4016_v15 }
 0xe48   : > { %v1881_v40 = vcombine.high %v1879_v27, %v1879_v27  ;;  %v1823_v46 = vrot.slane %v1804_v16, %v4279_v38  ;;  %v1830_v43 = vrot.slane %v1816_v34, %v4279_v38  ;;  %v4694_v21 = vsel %vm1485_vm6, %v1647_v56, %v4598_v59  ;;  %v3658_v56 = vpop.f32.mrf.mxu1 }
 0xe49   : > { %v1611_v47 = vrot.slane %v1532_v9, %v4016_v15  ;;  %v1615_v50 = vrot.slane %v1534_v36, %v4016_v15  ;;  %v1902_v8 = vrot.slane %v1880_v24, %v4279_v38  ;;  %v4702_v44 = vsel %vm1485_vm6, %v1651_v31, %v4602_v58 }
 0xe4a   : > { %v4707_v12 = vsel %vm1485_vm6, %v1591_v32, %v4608_v61  ;;  %v4711_v59 = vsel %vm1485_vm6, %v1607_v39, %v1344_v30  ;;  %v1895_v55 = vrot.slane %v1879_v27, %v4279_v38  ;;  %v1603_v16 = vrot.slane %v1535_v2, %v4016_v15 }
 0xe4b   : > { %v1619_v28 = vrot.slane %v1536_v35, %v4016_v15  ;;  %v4718_v53 = vsel %vm1485_vm6, %v1595_v3, %v1341_v25  ;;  %v1910_v58 = vcombine.high %v1888_v5, %v1888_v5  ;;  %v4723_v61 = vsel %vm1485_vm6, %v1599_v37, %v4622_v42 }
 0xe4c   : > { %v1909_v30 = vrot.slane %v1881_v40, %v4279_v38  ;;  %v1831_v4 = vcombine.high %v1823_v46, %v1823_v46  ;;  %v1832_v9 = vcombine.high %v1830_v43, %v1830_v43  ;;  %v1673_v63 = vsel %vm1485_vm6, %v1611_v47, %v4626_v29 }
 0xe4d   : > { %v1674_v25 = vsel %vm1485_vm6, %v1615_v50, %v4631_v33  ;;  %v1912_v27 = vcombine.high %v1902_v8, %v1902_v8  ;;  %v1911_v34 = vcombine.high %v1895_v55, %v1895_v55  ;;  %v1951_v31 = vrot.slane %v1888_v5, %v4016_v15 }
 0xe4e   : > { %v1955_v42 = vrot.slane %v1902_v8, %v4016_v15  ;;  %v2193_v36 = vcombine.high %v3658_v56, %v3658_v56  ;;  %v1959_v24 = vrot.slane %v1910_v58, %v4016_v15  ;;  %v1839_v32 = vrot.slane %v1823_v46, %v4279_v38  ;;  %v2132_v8 = vpop.f32.mrf.mxu1 }
 0xe4f   : > { %v1846_v39 = vrot.slane %v1830_v43, %v4279_v38  ;;  %v2200_v29 = vrot.slane %v3658_v56, %v4279_v38  ;;  %v1913_v2 = vcombine.high %v1909_v30, %v1909_v30  ;;  %v1967_v33 = vrot.slane %v1895_v55, %v4016_v15 }
 0xe50   : > { %v1853_v35 = vrot.slane %v1831_v4, %v4279_v38  ;;  %v1860_v3 = vrot.slane %v1832_v9, %v4279_v38  ;;  %v1671_v5 = vsel %vm1485_vm6, %v1603_v16, %v4638_v48  ;;  %v1675_v37 = vsel %vm1485_vm6, %v1619_v28, %v4648_v52 }
 0xe51   : > { %v1963_v40 = vrot.slane %v1912_v27, %v4016_v15  ;;  %v1971_v46 = vrot.slane %v1909_v30, %v4016_v15  ;;  %v1975_v43 = vrot.slane %v1911_v34, %v4016_v15  ;;  %v4754_v47 = vsel %vm1813_vm7, %v1951_v31, %v4654_v23 }
 0xe52   : > { %v4759_v50 = vsel %vm1813_vm7, %v1955_v42, %v4659_v1  ;;  %v2207_v48 = vrot.slane %v2193_v36, %v4279_v38  ;;  %v4765_v52 = vsel %vm1813_vm7, %v1959_v24, %v4665_v19  ;;  %v1861_v55 = vcombine.high %v1839_v32, %v1839_v32 }
 0xe53   : > { %v1862_v16 = vcombine.high %v1846_v39, %v1846_v39  ;;  %v2208_v28 = vcombine.high %v2200_v29, %v2200_v29  ;;  %v1979_v58 = vrot.slane %v1913_v2, %v4016_v15  ;;  %v4771_v23 = vsel %vm1813_vm7, %v1967_v33, %v4672_v22 }
 0xe54   : > { %v1863_v1 = vcombine.high %v1853_v35, %v1853_v35  ;;  %v1864_v56 = vcombine.high %v1860_v3, %v1860_v3  ;;  %v2007_v30 = vsel %vm1813_vm7, %v1963_v40, %v4677_v26  ;;  %v4779_v19 = vsel %vm1813_vm7, %v1971_v46, %v4682_v41  ;;  %v3677_v41 = vpop.f32.mrf.mxu0 }
 0xe55   : > { %v1919_v4 = vrot.slane %v1839_v32, %v4016_v15  ;;  %v2144_v9 = vcombine.high %v2132_v8, %v2132_v8  ;;  %v1923_v27 = vrot.slane %v1853_v35, %v4016_v15  ;;  %v1935_v34 = vrot.slane %v1846_v39, %v4016_v15 }
 0xe56   : > { %v2209_v22 = vcombine.high %v2207_v48, %v2207_v48  ;;  %v2216_v31 = vrot.slane %v2200_v29, %v4279_v38  ;;  %v1927_v42 = vrot.slane %v1861_v55, %v4016_v15  ;;  %v1939_v36 = vrot.slane %v1860_v3, %v4016_v15 }
 0xe57   : > { %v1943_v26 = vrot.slane %v1862_v16, %v4016_v15  ;;  %v2230_v24 = vrot.slane %v2208_v28, %v4279_v38  ;;  %v2010_v32 = vsel %vm1813_vm7, %v1975_v43, %v4694_v21  ;;  %v1931_v2 = vrot.slane %v1863_v1, %v4016_v15  ;;  %v4805_v21 = vpop.permute.xlu1 %3209  ;;  %v2460_v16 = vpop.f32.mrf.mxu0 }
 0xe58   : > { %v1947_v39 = vrot.slane %v1864_v56, %v4016_v15  ;;  %v2151_v33 = vrot.slane %v2132_v8, %v4279_v38  ;;  %v2011_v29 = vsel %vm1813_vm7, %v1979_v58, %v4702_v44  ;;  %v4801_v35 = vsel %vm1813_vm7, %v1919_v4, %v4707_v12 }
 0xe59   : > { %v2223_v3 = vrot.slane %v2207_v48, %v4279_v38  ;;  %v2158_v40 = vrot.slane %v2144_v9, %v4279_v38  ;;  %v4810_v46 = vsel %vm1813_vm7, %v1923_v27, %v4718_v53  ;;  %v4815_v44 = vsel %vm1813_vm7, %v1935_v34, %v4711_v59 }
 0xe5a   : > { %v2237_v43 = vrot.slane %v2209_v22, %v4279_v38  ;;  %v2238_v12 = vcombine.high %v2216_v31, %v2216_v31  ;;  %v4821_v48 = vsel %vm1813_vm7, %v1927_v42, %v4723_v61  ;;  %v4825_v8 = vsel %vm1813_vm7, %v1939_v36, %v1673_v63 }
 0xe5b   : > { %v4829_v53 = vsel %vm1813_vm7, %v1943_v26, %v1674_v25  ;;  %v2240_v55 = vcombine.high %v2230_v24, %v2230_v24  ;;  %v4833_v59 = vsel %vm1813_vm7, %v1931_v2, %v1671_v5  ;;  %v4837_v28 = vsel %vm1813_vm7, %v1947_v39, %v1675_v37  ;;  %v4847_v42 = vpop.permute.xlu1 %3213 }
 0xe5c   : > { %v2159_v61 = vcombine.high %v2151_v33, %v2151_v33  ;;  %v2521_v58 = vcombine.high %v3677_v41, %v3677_v41  ;;  %v2239_v1 = vcombine.high %v2223_v3, %v2223_v3  ;;  %v2279_v63 = vrot.slane %v2216_v31, %v4016_v15 }
 0xe5d   : > { %v2283_v56 = vrot.slane %v2230_v24, %v4016_v15  ;;  %v2160_v4 = vcombine.high %v2158_v40, %v2158_v40  ;;  %v2241_v25 = vcombine.high %v2237_v43, %v2237_v43  ;;  %v2287_v9 = vrot.slane %v2238_v12, %v4016_v15 }
 0xe5e   : > { %v2472_v27 = vcombine.high %v2460_v16, %v2460_v16  ;;  %v2291_v5 = vrot.slane %v2240_v55, %v4016_v15  ;;  %v2295_v34 = vrot.slane %v2223_v3, %v4016_v15  ;;  %v2167_v37 = vrot.slane %v2151_v33, %v4279_v38 }
 0xe5f   : > { %v2528_v22 = vrot.slane %v3677_v41, %v4279_v38  ;;  %v2299_v31 = vrot.slane %v2237_v43, %v4016_v15  ;;  %v2174_v36 = vrot.slane %v2158_v40, %v4279_v38  ;;  %v2181_v26 = vrot.slane %v2159_v61, %v4279_v38 }
 0xe60   : > { %v2535_v24 = vrot.slane %v2521_v58, %v4279_v38  ;;  %v2303_v2 = vrot.slane %v2239_v1, %v4016_v15  ;;  %v4857_v39 = vsel %vm2141_vm8, %v2279_v63, %v4754_v47  ;;  %v4862_v41 = vsel %vm2141_vm8, %v2283_v56, %v4759_v50 }
 0xe61   : > { %v2188_v33 = vrot.slane %v2160_v4, %v4279_v38  ;;  %v2307_v3 = vrot.slane %v2241_v25, %v4016_v15  ;;  %v4869_v40 = vsel %vm2141_vm8, %v2287_v9, %v4765_v52  ;;  %v2479_v43 = vrot.slane %v2460_v16, %v4279_v38  ;;  %v4893_v4 = vpop.permute.xlu1 %3215  ;;  %v4895_v25 = vpop.permute.xlu0 %3211 }
 0xe62   : > { %v2486_v12 = vrot.slane %v2472_v27, %v4279_v38  ;;  %v4875_v47 = vsel %vm2141_vm8, %v2291_v5, %v2007_v30  ;;  %v4880_v50 = vsel %vm2141_vm8, %v2295_v34, %v4771_v23  ;;  %v2189_v55 = vcombine.high %v2167_v37, %v2167_v37 }
 0xe63   : > { %v2536_v61 = vcombine.high %v2528_v22, %v2528_v22  ;;  %v4885_v52 = vsel %vm2141_vm8, %v2299_v31, %v4779_v19  ;;  %v2190_v58 = vcombine.high %v2174_v36, %v2174_v36  ;;  %v2191_v16 = vcombine.high %v2181_v26, %v2181_v26 }
 0xe64   : > { %v2537_v1 = vcombine.high %v2535_v24, %v2535_v24  ;;  %v4889_v63 = vsel %vm2141_vm8, %v2303_v2, %v2010_v32  ;;  %v2192_v30 = vcombine.high %v2188_v33, %v2188_v33  ;;  %v2247_v56 = vrot.slane %v2167_v37, %v4016_v15 }
 0xe65   : > { %v2263_v23 = vrot.slane %v2174_v36, %v4016_v15  ;;  %v4899_v19 = vsel %vm2141_vm8, %v2307_v3, %v2011_v29  ;;  %v2251_v9 = vrot.slane %v2181_v26, %v4016_v15  ;;  %v2487_v27 = vcombine.high %v2479_v43, %v2479_v43 }
 0xe66   : > { %v2488_v5 = vcombine.high %v2486_v12, %v2486_v12  ;;  %v2255_v32 = vrot.slane %v2189_v55, %v4016_v15  ;;  %v2267_v34 = vrot.slane %v2188_v33, %v4016_v15  ;;  %v2544_v37 = vrot.slane %v2528_v22, %v4279_v38 }
 0xe67   : > { %v2558_v31 = vrot.slane %v2536_v61, %v4279_v38  ;;  %v2259_v36 = vrot.slane %v2191_v16, %v4016_v15  ;;  %v2271_v2 = vrot.slane %v2190_v58, %v4016_v15  ;;  %v2551_v17 = vrot.slane %v2535_v24, %v4279_v38 }
 0xe68   : > { %v2565_v29 = vrot.slane %v2537_v1, %v4279_v38  ;;  %v2275_v26 = vrot.slane %v2192_v30, %v4016_v15  ;;  %v2324_v3 = vsel %vm2141_vm8, %v2247_v56, %v4801_v35  ;;  %v2328_v22 = vsel %vm2141_vm8, %v2263_v23, %v4815_v44  ;;  %v4930_v1 = vpop.permute.xlu1 %3219  ;;  %v4932_v30 = vpop.permute.xlu0 %3217 }
 0xe69   : > { %v2495_v33 = vrot.slane %v2479_v43, %v4279_v38  ;;  %v2325_v55 = vsel %vm2141_vm8, %v2251_v9, %v4810_v46  ;;  %v2502_v24 = vrot.slane %v2486_v12, %v4279_v38  ;;  %v2509_v61 = vrot.slane %v2487_v27, %v4279_v38 }
 0xe6a   : > { %v2516_v58 = vrot.slane %v2488_v5, %v4279_v38  ;;  %v2326_v35 = vsel %vm2141_vm8, %v2255_v32, %v4821_v48  ;;  %v2329_v44 = vsel %vm2141_vm8, %v2267_v34, %v4825_v8  ;;  %v2566_v16 = vcombine.high %v2544_v37, %v2544_v37 }
 0xe6b   : > { %v2568_v43 = vcombine.high %v2558_v31, %v2558_v31  ;;  %v2327_v46 = vsel %vm2141_vm8, %v2259_v36, %v4833_v59  ;;  %v2330_v12 = vsel %vm2141_vm8, %v2271_v2, %v4829_v53  ;;  %v2567_v56 = vcombine.high %v2551_v17, %v2551_v17 }
 0xe6c   : > { %v2569_v48 = vcombine.high %v2565_v29, %v2565_v29  ;;  %v2331_v8 = vsel %vm2141_vm8, %v2275_v26, %v4837_v28  ;;  %v2607_v23 = vrot.slane %v2544_v37, %v4016_v15  ;;  %v2611_v9 = vrot.slane %v2558_v31, %v4016_v15 }
 0xe6d   : > { %v2517_v27 = vcombine.high %v2495_v33, %v2495_v33  ;;  %v2518_v5 = vcombine.high %v2502_v24, %v2502_v24  ;;  %v2519_v32 = vcombine.high %v2509_v61, %v2509_v61  ;;  %v2520_v59 = vcombine.high %v2516_v58, %v2516_v58 }
 0xe6e   : > { %v2615_v34 = vrot.slane %v2566_v16, %v4016_v15  ;;  %v2619_v53 = vrot.slane %v2568_v43, %v4016_v15  ;;  %v2623_v36 = vrot.slane %v2551_v17, %v4016_v15  ;;  %v2627_v2 = vrot.slane %v2565_v29, %v4016_v15  ;;  %v4962_v43 = vpop.permute.xlu1 %3223 }
 0xe6f   : > { %v2631_v28 = vrot.slane %v2567_v56, %v4016_v15  ;;  %v2635_v37 = vrot.slane %v2569_v48, %v4016_v15  ;;  %v2575_v31 = vrot.slane %v2495_v33, %v4016_v15  ;;  %v2591_v26 = vrot.slane %v2502_v24, %v4016_v15  ;;  %v4964_v56 = vpop.permute.xlu0 %3221 }
 0xe70   : > { %v2660_v20 = vsel %vm2469_vm9, %v2607_v23, %v4857_v39  ;;  %v2661_v16 = vsel %vm2469_vm9, %v2611_v9, %v4862_v41  ;;  %v2579_v17 = vrot.slane %v2509_v61, %v4016_v15  ;;  %v2583_v29 = vrot.slane %v2517_v27, %v4016_v15 }
 0xe71   : > { %v2587_v33 = vrot.slane %v2519_v32, %v4016_v15  ;;  %v2595_v24 = vrot.slane %v2516_v58, %v4016_v15  ;;  %v2599_v48 = vrot.slane %v2518_v5, %v4016_v15  ;;  %v2603_v39 = vrot.slane %v2520_v59, %v4016_v15 }
 0xe72   : > { %v2662_v41 = vsel %vm2469_vm9, %v2615_v34, %v4869_v40  ;;  %v4976_v61 = vsel %vm2469_vm9, %v2619_v53, %v4875_v47  ;;  %v2664_v23 = vsel %vm2469_vm9, %v2623_v36, %v4880_v50  ;;  %v4984_v58 = vsel %vm2469_vm9, %v2627_v2, %v4885_v52  ;;  %v3228_v36 = vpop.permute.xlu1 %3227 }
 0xe73   : > { %v4989_v9 = vsel %vm2469_vm9, %v2631_v28, %v4889_v63  ;;  %v4993_v40 = vsel %vm2469_vm9, %v2575_v31, %v2324_v3  ;;  %v4997_v47 = vsel %vm2469_vm9, %v2591_v26, %v2328_v22  ;;  %v5002_v52 = vsel %vm2469_vm9, %v2635_v37, %v4899_v19 }
 0xe74   : > { %v5006_v27 = vsel %vm2469_vm9, %v2579_v17, %v2325_v55  ;;  %v5010_v63 = vsel %vm2469_vm9, %v2583_v29, %v2326_v35  ;;  %v5015_v22 = vsel %vm2469_vm9, %v2587_v33, %v2327_v46  ;;  %v5019_v32 = vsel %vm2469_vm9, %v2595_v24, %v2329_v44  ;;  %v3226_v44 = vpop.permute.xlu0 %3225 }
 0xe75   : > { %v5023_v19 = vsel %vm2469_vm9, %v2599_v48, %v2330_v12  ;;  %v5027_v55 = vsel %vm2469_vm9, %v2603_v39, %v2331_v8 }
 0xed9   : > { %v3696_v50 = vpop.f32.mrf.mxu1 }
 0xeda   : > { %v2849_v3 = vcombine.high %v3696_v50, %v3696_v50  ;;  %v2856_v5 = vrot.slane %v3696_v50, %v4279_v38 }
 0xedb   : > { %v2788_v35 = vpop.f32.mrf.mxu1 }
 0xedc   : > { %v2863_v59 = vrot.slane %v2849_v3, %v4279_v38  ;;  %v2864_v34 = vcombine.high %v2856_v5, %v2856_v5  ;;  %v2872_v46 = vrot.slane %v2856_v5, %v4279_v38  ;;  %v2800_v53 = vcombine.high %v2788_v35, %v2788_v35 }
 0xedd   : > { %v2807_v12 = vrot.slane %v2788_v35, %v4279_v38 }
 0xede   : > { %v2865_v2 = vcombine.high %v2863_v59, %v2863_v59  ;;  %v2879_v8 = vrot.slane %v2863_v59, %v4279_v38  ;;  %v2886_v28 = vrot.slane %v2864_v34, %v4279_v38  ;;  %v2894_v37 = vcombine.high %v2872_v46, %v2872_v46 }
 0xedf   : > { %v2935_v31 = vrot.slane %v2872_v46, %v4016_v15  ;;  %v2814_v26 = vrot.slane %v2800_v53, %v4279_v38  ;;  %v2815_v17 = vcombine.high %v2807_v12, %v2807_v12  ;;  %v2823_v29 = vrot.slane %v2807_v12, %v4279_v38  ;;  %v5057_v12 = vpop.permute.xlu1 %3231 }
 0xee0   : > { %v5042_v33 = vrot.slane %v2865_v2, %v4279_v38  ;;  %v2895_v24 = vcombine.high %v2879_v8, %v2879_v8  ;;  %v2896_v48 = vcombine.high %v2886_v28, %v2886_v28  ;;  %v2939_v39 = vrot.slane %v2886_v28, %v4016_v15  ;;  %v5059_v2 = vpop.permute.xlu0 %3229 }
 0xee1   : > { %v2943_v50 = vrot.slane %v2894_v37, %v4016_v15  ;;  %v2951_v3 = vrot.slane %v2879_v8, %v4016_v15  ;;  %v2988_v5 = vsel %vm2797_vm10, %v2935_v31, %v2660_v20  ;;  %v2816_v35 = vcombine.high %v2814_v26, %v2814_v26  ;;  %5285 = vst [vmem:[#allocation7_spill] sm:$0xff] %v5059_v2 }
 0xee2   : > { %v2897_v59 = vcombine.high %v5042_v33, %v5042_v33  ;;  %v2947_v34 = vrot.slane %v2896_v48, %v4016_v15  ;;  %v2955_v46 = vrot.slane %v5042_v33, %v4016_v15  ;;  %v5055_v53 = vrot.slane %v2895_v24, %v4016_v15 }
 0xee3   : > { %v2989_v8 = vsel %vm2797_vm10, %v2939_v39, %v2661_v16  ;;  %v5065_v20 = vsel %vm2797_vm10, %v2943_v50, %v2662_v41  ;;  %v5069_v28 = vsel %vm2797_vm10, %v2951_v3, %v2664_v23  ;;  %v3184_v37 = vsub.f32 %v2988_v5, %v4323_v57 }
 0xee4   : > { %v2963_v31 = vrot.slane %v2897_v59, %v4016_v15  ;;  %v2830_v33 = vrot.slane %v2814_v26, %v4279_v38  ;;  %v2837_v24 = vrot.slane %v2815_v17, %v4279_v38  ;;  %v2844_v48 = vrot.slane %v2816_v35, %v4279_v38  ;;  %v3236_v35 = vpop.permute.xlu1 %3235  ;;  %v3234_v59 = vpop.permute.xlu0 %3233 }
 0xee5   : > { %v2845_v2 = vcombine.high %v2823_v29, %v2823_v29  ;;  %v2903_v16 = vrot.slane %v2823_v29, %v4016_v15  ;;  %3201 = vst.msk [vmem:[%s5077_s6 + $0x40] sm:$0xff] %vm3192_vm11, %v3184_v37  ;;  %v3185_v57 = vsub.f32 %v2989_v8, %v4341_v0  ;;  %v2991_v41 = vsel %vm2797_vm10, %v2947_v34, %v4976_v61 }
 0xee6   : > { %v2846_v23 = vcombine.high %v2830_v33, %v2830_v33  ;;  %v2847_v26 = vcombine.high %v2837_v24, %v2837_v24  ;;  %v2848_v38 = vcombine.high %v2844_v48, %v2844_v48  ;;  %v2907_v17 = vrot.slane %v2837_v24, %v4016_v15  ;;  %3266 = vst.msk [vmem:[%s5077_s6 + $0x40] sm:$0xff] %vm3257_vm12, %v3226_v44 }
 0xee7   : > { %v2911_v29 = vrot.slane %v2845_v2, %v4016_v15  ;;  %v2919_v39 = vrot.slane %v2830_v33, %v4016_v15  ;;  %v2923_v50 = vrot.slane %v2844_v48, %v4016_v15  ;;  %v2980_v0 = vsel %vm2797_vm10, %v2903_v16, %v4993_v40  ;;  %3202 = vst.msk [vmem:[%s5077_s6 + $0x48] sm:$0xff] %vm3192_vm11, %v3185_v57 }
 0xee8   : > { %v2915_v61 = vrot.slane %v2847_v26, %v4016_v15  ;;  %v2927_v3 = vrot.slane %v2846_v23, %v4016_v15  ;;  %v2931_v5 = vrot.slane %v2848_v38, %v4016_v15  ;;  %v2981_v44 = vsel %vm2797_vm10, %v2907_v17, %v5006_v27  ;;  %3267 = vst.msk [vmem:[%s5077_s6 + $0x48] sm:$0xff] %vm3257_vm12, %v3228_v36 }
 0xee9   : > { %v2982_v40 = vsel %vm2797_vm10, %v2911_v29, %v5010_v63  ;;  %v2984_v34 = vsel %vm2797_vm10, %v2919_v39, %v4997_v47  ;;  %v2985_v15 = vsel %vm2797_vm10, %v2923_v50, %v5019_v32  ;;  %v3176_v27 = vsub.f32 %v2980_v0, %v4286_v7 }
 0xeea   : > { %v2983_v36 = vsel %vm2797_vm10, %v2915_v61, %v5015_v22  ;;  %v2986_v63 = vsel %vm2797_vm10, %v2927_v3, %v5023_v19  ;;  %v2987_v47 = vsel %vm2797_vm10, %v2931_v5, %v5027_v55  ;;  %v3177_v2 = vsub.f32 %v2981_v44, %v4289_v10 }
 0xeeb   : > { %v3178_v32 = vsub.f32 %v2982_v40, %v4295_v11  ;;  %v3179_v7 = vsub.f32 %v2983_v36, %v4306_v49  ;;  %v3180_v22 = vsub.f32 %v2984_v34, %v4300_v45  ;;  %v3181_v8 = vsub.f32 %v2985_v15, %v4318_v54  ;;  %3193 = vst.msk [vmem:[%s5077_s6] sm:$0xff] %vm3192_vm11, %v3176_v27 }
 0xeec   : > { %v3182_v19 = vsub.f32 %v2986_v63, %v4312_v51  ;;  %v3183_v10 = vsub.f32 %v2987_v47, %v4329_v60  ;;  %3194 = vst.msk [vmem:[%s5077_s6 + $0x8] sm:$0xff] %vm3192_vm11, %v3177_v2  ;;  %v3187_v11 = vsub.f32 %v2991_v41, %v4351_v13  ;;  %v3186_v45 = vsub.f32 %v5065_v20, %v4335_v62  ;;  %v3240_v62 = vpop.permute.xlu1 %3239 }
 0xeed   : > { %3258 = vst.msk [vmem:[%s5077_s6] sm:$0xff] %vm3257_vm12, %v4805_v21  ;;  %3259 = vst.msk [vmem:[%s5077_s6 + $0x8] sm:$0xff] %vm3257_vm12, %v4895_v25  ;;  %v2993_v49 = vsel %vm2797_vm10, %v2955_v46, %v4984_v58  ;;  %v3188_v51 = vsub.f32 %v5069_v28, %v4346_v6  ;;  %v2995_v54 = vsel %vm2797_vm10, %v2963_v31, %v5002_v52  ;;  %v5286_v6 = vld [vmem:[#allocation6_spill] sm:$0xff]  ;;  %v3238_v21 = vpop.permute.xlu0 %3237 }
 0xeee   : > { %3195 = vst.msk [vmem:[%s5077_s6 + $0x10] sm:$0xff] %vm3192_vm11, %v3178_v32  ;;  %3196 = vst.msk [vmem:[%s5077_s6 + $0x18] sm:$0xff] %vm3192_vm11, %v3179_v7  ;;  %v2994_v60 = vsel %vm2797_vm10, %v5055_v53, %v4989_v9  ;;  %v3189_v14 = vsub.f32 %v2993_v49, %v4362_v18  ;;  %v3191_v13 = vsub.f32 %v2995_v54, %v5286_v6  ;;  %v5288_v18 = vld [vmem:[#allocation7_spill] sm:$0xff] }
 0xeef   : > { %3197 = vst.msk [vmem:[%s5077_s6 + $0x20] sm:$0xff] %vm3192_vm11, %v3180_v22  ;;  %3198 = vst.msk [vmem:[%s5077_s6 + $0x28] sm:$0xff] %vm3192_vm11, %v3181_v8 }
 0xef0   : > { %3199 = vst.msk [vmem:[%s5077_s6 + $0x30] sm:$0xff] %vm3192_vm11, %v3182_v19  ;;  %3200 = vst.msk [vmem:[%s5077_s6 + $0x38] sm:$0xff] %vm3192_vm11, %v3183_v10 }
 0xef1   : > { %3260 = vst.msk [vmem:[%s5077_s6 + $0x10] sm:$0xff] %vm3257_vm12, %v4847_v42  ;;  %3261 = vst.msk [vmem:[%s5077_s6 + $0x18] sm:$0xff] %vm3257_vm12, %v4893_v4  ;;  %v5287_v42 = vld [vmem:[#allocation5_spill] sm:$0xff] }
 0xef2   : > { %3262 = vst.msk [vmem:[%s5077_s6 + $0x20] sm:$0xff] %vm3257_vm12, %v4932_v30  ;;  %3263 = vst.msk [vmem:[%s5077_s6 + $0x28] sm:$0xff] %vm3257_vm12, %v4930_v1  ;;  %v3190_v4 = vsub.f32 %v2994_v60, %v5287_v42 }
 0xef3   : > { %3204 = vst.msk [vmem:[%s5077_s6 + $0x58] sm:$0xff] %vm3192_vm11, %v3187_v11  ;;  %3203 = vst.msk [vmem:[%s5077_s6 + $0x50] sm:$0xff] %vm3192_vm11, %v3186_v45 }
 0xef4   : > { %3264 = vst.msk [vmem:[%s5077_s6 + $0x30] sm:$0xff] %vm3257_vm12, %v4964_v56  ;;  %3265 = vst.msk [vmem:[%s5077_s6 + $0x38] sm:$0xff] %vm3257_vm12, %v4962_v43 }
 0xef5   : > { %3269 = vst.msk [vmem:[%s5077_s6 + $0x58] sm:$0xff] %vm3257_vm12, %v5057_v12  ;;  %3268 = vst.msk [vmem:[%s5077_s6 + $0x50] sm:$0xff] %vm3257_vm12, %v5288_v18 }
 0xef6   : > { %3205 = vst.msk [vmem:[%s5077_s6 + $0x60] sm:$0xff] %vm3192_vm11, %v3188_v51  ;;  %3206 = vst.msk [vmem:[%s5077_s6 + $0x68] sm:$0xff] %vm3192_vm11, %v3189_v14 }
 0xef7   : > { %3270 = vst.msk [vmem:[%s5077_s6 + $0x60] sm:$0xff] %vm3257_vm12, %v3234_v59  ;;  %3271 = vst.msk [vmem:[%s5077_s6 + $0x68] sm:$0xff] %vm3257_vm12, %v3236_v35 }
 0xef8   : > { %3208 = vst.msk [vmem:[%s5077_s6 + $0x78] sm:$0xff] %vm3192_vm11, %v3191_v13  ;;  %3207 = vst.msk [vmem:[%s5077_s6 + $0x70] sm:$0xff] %vm3192_vm11, %v3190_v4 }
 0xef9   : > { %3273 = vst.msk [vmem:[%s5077_s6 + $0x78] sm:$0xff] %vm3257_vm12, %v3240_v62  ;;  %3272 = vst.msk [vmem:[%s5077_s6 + $0x70] sm:$0xff] %vm3257_vm12, %v3238_v21 }
 0xefa   : > { %3781 = shalt.err (!%p3778_p5)
}
 0xefb   : > { %s3782_s22 = scalar_lea.hbm %s5193_s11, 2048  ;;  %s3786_s29 = scalar_lea.hbm %s5278_s4, 4096 }
 0xefc   : > { %p3783_p6 = scmp.ne.s32.totalorder %s5193_s11, %s3782_s22  ;;  %p3787_p10 = scmp.lt.s32.totalorder %s5193_s11, %s5278_s4 }
 0xefd   : > { %p3788_p11 = scmp.lt.s32.totalorder %s3786_s29, %s3782_s22 }
 0xefe   : > { %p3784_p7 = pnand %p3783_p6, %p3920_p4 }
 0xeff   : > { %p3789_p12 = por %p3788_p11, %p3787_p10 }
 0xf00   : > { %p3785_p9 = pneg %p3784_p7 }
 0xf02   : > { %p3790_p13 = pnand %p3789_p12, %p3785_p9 }
 0xf04   : > { %3793 = shalt.err (!%p3790_p13)
}
 0xf05   : > { %s3853_s6 = smov 128   ;;  %s3854_s7 = smov 8  }
 0xf06   : > { %3697 = dma.vmem_to_hbm [thread:$0]  (%p3920_p4), %s5197_s8, 2048, %s5193_s11, %s5229_s18, %s3853_s6, %s3853_s6, %s3854_s7  }
 0xf07 PF: > { %p3703_p0 = scmp.ge.s32.totalorder %s3844_s20, 2  ;;  %s3305_s9 = sand.u32 1, %s3824_s15  }
 0xf08   : > { %s3306_s10 = scalar_lea.sflag [#allocation3], %s3305_s9 }
 0xf09   : > { %p3700_p1 = pnand %p3703_p0, %p3927_p8 }
 0xf0b   : > { %p3701_p2 = pneg %p3700_p1 }
 0xf0d   : > { %3819 = dma.done.wait (%p3701_p2), %s3306_s10, 2048  }
 0xf0e   : > { %3821 = vsyncadd (%p3701_p2), %s3306_s10, 4294965248  ;;  %s17_s20 = sadd.s32 1, %s3844_s20   ;;  %s5289_s15 = smov %s3828_s16 }
 0xf0f   : > { %p14_p3 = scmp.ge.s32.totalorder %s17_s20, 4   ;;  %s5290_s16 = smov %s3832_s17 }
 0xf10   : > { %s5291_s17 = smov %s3933_s28  ;;  %s5292_s18 = smov %s3840_s19 }
 0xf11   : > { %s5293_s19 = smov %s5295_s23  ;;  %16 = sbr.rel (!%p14_p3) target bundleno = 4 (0x4), region = 80 }
 0xf16   :  { %3311 = vsyncpa [#allocation3], 1 }
 0xf17   :  { %3313 = vsyncpa [#allocation3 + $0x1], 1 }

</bundles_post_ra>
